<compile_context>
chip_gen: v5e
topology: v5e:2x2
jax: 0.10.0
libtpu: 0.0.40
codegen_flags: <defaults>
</compile_context>

<pallas_src>
import jax
import jax.numpy as jnp
from jax import lax
from jax.experimental import pallas as pl
from jax.experimental.pallas import tpu as pltpu

LANE = 128
_COL = 8          # column offset of the padded-image interior (sublane aligned)


def _round_up(x, m):
    return (x + m - 1) // m * m


def _down_fused_kernel(x_ref, w1_ref, b1_ref, w2_ref, b2_ref, o_ref,
                       xp1_ref, xp2_ref):
    """One batch element per grid step.

    x_ref  : (1, Hh, 2, Wh, 2*Cin) bf16   pre-pool input, pool-pairs grouped
    w1_ref : (3, 3*Cin,   CmidP)   bf16   conv1 weights, BN folded, K-order (kx,ky,cin)
    b1_ref : (1, CmidP)            f32    conv1 folded bias
    w2_ref : (3, 3*CmidP, CoutP)   bf16   conv2 weights, BN folded, K-order (kx,ky,cin)
    b2_ref : (1, CoutP)            f32    conv2 folded bias
    o_ref  : (1, Hh*Wh, CoutP)     f32    lane-dense output slab
    xp1_ref: (Hh+2, Wh+16, Cin)    bf16   zero-halo pooled input  (interior at col 8)
    xp2_ref: (Hh+2, Wh+16, CmidP)  bf16   zero-halo conv1 output  (interior at col 8)
    """
    Hh = x_ref.shape[1]
    Wh = x_ref.shape[3]
    Cin = x_ref.shape[4] // 2

    def write_padded(dst_ref, interior):
        # Refresh only the thin halo strips (not the whole buffer), then write the
        # interior with a sublane-aligned (offset-8) store.  Done every grid step so
        # it stays correct under megacore grid sharding.
        Wp = dst_ref.shape[1]
        C = dst_ref.shape[2]
        dt = dst_ref.dtype
        dst_ref[0:1, :, :] = jnp.zeros((1, Wp, C), dt)                      # top halo row
        dst_ref[Hh + 1:Hh + 2, :, :] = jnp.zeros((1, Wp, C), dt)            # bottom halo row
        dst_ref[1:Hh + 1, 0:_COL, :] = jnp.zeros((Hh, _COL, C), dt)         # left halo cols
        dst_ref[1:Hh + 1, _COL + Wh:Wp, :] = jnp.zeros((Hh, Wp - _COL - Wh, C), dt)
        dst_ref[1:Hh + 1, _COL:_COL + Wh, :] = interior

    def conv3x3_relu(src_ref, w_ref, b_ref):
        # kx-chunked im2col: 3 matmul-accumulate issues with K = 3*C each.  The 3 dy
        # taps are leading-axis slices of one sublane-shifted slab, so only 3 shifted
        # copies are materialized per conv instead of 9 (3x lower peak patch VMEM).
        C = src_ref.shape[2]
        Nc = w_ref.shape[2]
        acc = jnp.zeros((Hh * Wh, Nc), jnp.float32)
        for dx in range(3):
            shifted = src_ref[:, _COL - 1 + dx:_COL - 1 + dx + Wh, :]       # (Hh+2, Wh, C)
            patch = jnp.concatenate([shifted[dy:dy + Hh] for dy in range(3)], axis=-1)
            acc = acc + jnp.dot(patch.reshape(Hh * Wh, 3 * C), w_ref[dx],
                                preferred_element_type=jnp.float32)
        return jnp.maximum(acc + b_ref[...], 0.0)           # folded BN bias + ReLU (f32)

    # ---- MaxPool2d(2) (exact in bf16: max commutes with monotone rounding) ---------
    x = x_ref[0]                                            # (Hh, 2, Wh, 2*Cin)
    xm = jnp.maximum(x[:, 0], x[:, 1])                      # pool over row pairs
    pooled = jnp.maximum(xm[:, :, :Cin], xm[:, :, Cin:])    # pool over col pairs

    # ---- conv1 + BN + ReLU (intermediate never leaves VMEM) ------------------------
    write_padded(xp1_ref, pooled)
    y1 = conv3x3_relu(xp1_ref, w1_ref, b1_ref)              # (Hh*Wh, CmidP) f32

    # ---- conv2 + BN + ReLU ----------------------------------------------------------
    CmidP = xp2_ref.shape[2]
    write_padded(xp2_ref, y1.astype(xp2_ref.dtype).reshape(Hh, Wh, CmidP))
    y2 = conv3x3_relu(xp2_ref, w2_ref, b2_ref)              # (Hh*Wh, CoutP) f32

    o_ref[0] = y2.astype(o_ref.dtype)                       # lane-dense unmasked store


def _vmem_limit_bytes(Hh, Wh, Cin, CmidP, CoutP):
    """Rough per-step VMEM footprint (double-buffered specs + scratch + temporaries)."""
    bf, f32 = 2, 4
    Wp = Wh + 2 * _COL
    est = 0
    est += 2 * (Hh * 2 * Wh * 2 * Cin) * bf               # double-buffered input block
    est += 2 * (3 * 3 * Cin * CmidP) * bf                 # w1 (double-buffered spec)
    est += 2 * (3 * 3 * CmidP * CoutP) * bf               # w2
    est += 2 * (CmidP + CoutP) * f32                      # biases
    est += 2 * (Hh * Wh * CoutP) * f32                    # double-buffered output block
    est += (Hh + 2) * Wp * (Cin + CmidP) * bf             # xp1 + xp2 scratch
    est += 2 * (Hh * Wh * 3 * max(Cin, CmidP)) * bf       # shifted slab + im2col patch
    est += 2 * (Hh * Wh * max(CmidP, CoutP)) * f32        # f32 accumulator / epilogue
    return int(min(max(2 * est + (8 << 20), 16 << 20), 44 << 20))


def down_pallas_nhwc(x_nhwc, w1f, b1f, w2f, b2f, out_ch):
    """x_nhwc: (N, H, W, Cin) f32/bf16.  Returns (N, H/2, W/2, out_ch) f32 (NHWC)."""
    N, H, W, Cin = x_nhwc.shape
    assert H % 2 == 0 and W % 2 == 0, "MaxPool2d(2) expects even H, W"
    Hh, Wh = H // 2, W // 2
    CmidP = w1f.shape[2]
    CoutP = w2f.shape[2]

    # Group the 2x2 pool pairs: (N, Hh, 2, Wh, 2*Cin); bf16 MXU operands.
    x_blk = x_nhwc.astype(jnp.bfloat16).reshape(N, Hh, 2, Wh, 2 * Cin)

    out = pl.pallas_call(
        _down_fused_kernel,
        out_shape=jax.ShapeDtypeStruct((N, Hh * Wh, CoutP), jnp.float32),
        grid=(N,),
        in_specs=[
            pl.BlockSpec((1, Hh, 2, Wh, 2 * Cin), lambda n: (n, 0, 0, 0, 0)),
            pl.BlockSpec((3, 3 * Cin, CmidP), lambda n: (0, 0, 0)),
            pl.BlockSpec((1, CmidP), lambda n: (0, 0)),
            pl.BlockSpec((3, 3 * CmidP, CoutP), lambda n: (0, 0, 0)),
            pl.BlockSpec((1, CoutP), lambda n: (0, 0)),
        ],
        out_specs=pl.BlockSpec((1, Hh * Wh, CoutP), lambda n: (n, 0, 0)),
        scratch_shapes=[
            pltpu.VMEM((Hh + 2, Wh + 2 * _COL, Cin), jnp.bfloat16),
            pltpu.VMEM((Hh + 2, Wh + 2 * _COL, CmidP), jnp.bfloat16),
        ],
        compiler_params=pltpu.CompilerParams(
            dimension_semantics=("parallel",),
            vmem_limit_bytes=_vmem_limit_bytes(Hh, Wh, Cin, CmidP, CoutP)),
    )(x_blk, w1f, b1f, w2f, b2f)

    return out[:, :, :out_ch].reshape(N, Hh, Wh, out_ch)


def prepare_folded_params(params, eps=1e-5):
    """Fold BN (eval) into conv weights/bias, permute K-order to (kx, ky, cin),
    pad Cmid/Cout to lane multiples, cast weights to bf16 (biases stay f32)."""
    s1 = params["g1"] / jnp.sqrt(params["v1"] + eps)
    w1 = params["w1"] * s1                                  # (3,3,Cin,Cmid)  (ky,kx,ci,co)
    b1 = (params["b1"] - params["m1"]) * s1 + params["be1"]
    s2 = params["g2"] / jnp.sqrt(params["v2"] + eps)
    w2 = params["w2"] * s2                                  # (3,3,Cmid,Cout)
    b2 = (params["b2"] - params["m2"]) * s2 + params["be2"]

    Cin = w1.shape[2]
    Cmid = w1.shape[3]
    Cout = w2.shape[3]
    CmidP = _round_up(Cmid, LANE)
    CoutP = _round_up(Cout, LANE)

    # conv1: pad output channels (Cmid) to a lane multiple; K-order -> (kx, ky, cin).
    w1 = jnp.pad(w1, ((0, 0), (0, 0), (0, 0), (0, CmidP - Cmid)))
    w1 = jnp.transpose(w1, (1, 0, 2, 3)).reshape(3, 3 * Cin, CmidP)
    b1 = jnp.pad(b1, (0, CmidP - Cmid)).reshape(1, CmidP)

    # conv2: pad input channels (Cmid) and output channels (Cout); same K-order.
    w2 = jnp.pad(w2, ((0, 0), (0, 0), (0, CmidP - Cmid), (0, CoutP - Cout)))
    w2 = jnp.transpose(w2, (1, 0, 2, 3)).reshape(3, 3 * CmidP, CoutP)
    b2 = jnp.pad(b2, (0, CoutP - Cout)).reshape(1, CoutP)

    return (w1.astype(jnp.bfloat16), b1.astype(jnp.float32),
            w2.astype(jnp.bfloat16), b2.astype(jnp.float32))


@jax.jit
def down_forward(x_nchw, params):
    """Matches down(in_ch, out_ch, bn=True).forward on NCHW input (BN eval mode)."""
    # TODO(synk): in a full NHWC pipeline, call down_pallas_nhwc directly and drop the
    #             two HBM transposes below (they exist only to match the NCHW contract).
    out_ch = params["w2"].shape[-1]
    w1f, b1f, w2f, b2f = prepare_folded_params(params)
    x_nhwc = jnp.transpose(x_nchw.astype(jnp.float32), (0, 2, 3, 1))
    y = down_pallas_nhwc(x_nhwc, w1f, b1f, w2f, b2f, out_ch)
    return jnp.transpose(y, (0, 3, 1, 2))                  # NHWC -> NCHW


def init_down_params(key, in_ch, out_ch):
    """Deterministic synthetic parameters matching double_conv(in_ch, out_ch, bn=True)."""
    ks = jax.random.split(key, 10)

    def conv_init(kw, kb, cin, cout):
        fan_in = cin * 9
        bound = 1.0 / jnp.sqrt(fan_in)
        w = jax.random.uniform(kw, (3, 3, cin, cout), jnp.float32, -bound, bound)
        b = jax.random.uniform(kb, (cout,), jnp.float32, -bound, bound)
        return w, b

    w1, b1 = conv_init(ks[0], ks[1], in_ch, out_ch)
    w2, b2 = conv_init(ks[2], ks[3], out_ch, out_ch)
    g1 = 1.0 + 0.1 * jax.random.normal(ks[4], (out_ch,), jnp.float32)
    be1 = 0.1 * jax.random.normal(ks[5], (out_ch,), jnp.float32)
    m1 = 0.1 * jax.random.normal(ks[6], (out_ch,), jnp.float32)
    v1 = jnp.abs(jax.random.normal(ks[7], (out_ch,), jnp.float32)) + 0.5
    g2 = 1.0 + 0.1 * jax.random.normal(ks[8], (out_ch,), jnp.float32)
    be2 = 0.1 * jax.random.normal(ks[9], (out_ch,), jnp.float32)
    m2 = jnp.zeros((out_ch,), jnp.float32)
    v2 = jnp.ones((out_ch,), jnp.float32)
    return dict(w1=w1, b1=b1, g1=g1, be1=be1, m1=m1, v1=v1,
                w2=w2, b2=b2, g2=g2, be2=be2, m2=m2, v2=v2)


def _reference_forward(x_nchw, params, eps=1e-5):
    """Pure-JAX f32 reference (reduce_window + lax conv) for verification."""
    x = lax.reduce_window(x_nchw, -jnp.inf, lax.max,
                          (1, 1, 2, 2), (1, 1, 2, 2), "VALID")

    def conv(x, w, b):
        return lax.conv_general_dilated(
            x, w, window_strides=(1, 1), padding="SAME",
            dimension_numbers=("NCHW", "HWIO", "NCHW")) + b[None, :, None, None]

    def bn(x, g, be, m, v):
        sc = g / jnp.sqrt(v + eps)
        return (x - m[None, :, None, None]) * sc[None, :, None, None] \
            + be[None, :, None, None]

    y = jnp.maximum(bn(conv(x, params["w1"], params["b1"]),
                       params["g1"], params["be1"], params["m1"], params["v1"]), 0.0)
    y = jnp.maximum(bn(conv(y, params["w2"], params["b2"]),
                       params["g2"], params["be2"], params["m2"], params["v2"]), 0.0)
    return y


if __name__ == "__main__":
    key = jax.random.PRNGKey(0)
    k_x, k_p = jax.random.split(key)

    N, in_ch, out_ch, H, W = 2, 4, 8, 16, 16
    x = jax.random.normal(k_x, (N, in_ch, H, W), jnp.float32)      # NCHW like PyTorch
    params = init_down_params(k_p, in_ch, out_ch)

    out = down_forward(x, params)
    out = jax.block_until_ready(out)

    ref = _reference_forward(x, params)
    assert out.shape == (N, out_ch, H // 2, W // 2)
    # bf16 MXU operands vs a pure-f32 reference -> relaxed tolerance.
    assert jnp.allclose(out, ref, atol=5e-2, rtol=5e-2), "mismatch vs reference"

    print("KERNEL_OK")
</pallas_src>

<mosaic_0001>
module attributes {stable_mosaic.version = 11 : i64} {
  func.func @_down_fused_kernel(%arg0: i32, %arg1: memref<1x8x2x8x8xbf16, #tpu.memory_space<vmem>>, %arg2: memref<3x12x128xbf16, #tpu.memory_space<vmem>>, %arg3: memref<1x128xf32, #tpu.memory_space<vmem>>, %arg4: memref<3x384x128xbf16, #tpu.memory_space<vmem>>, %arg5: memref<1x128xf32, #tpu.memory_space<vmem>>, %arg6: memref<1x64x128xf32, #tpu.memory_space<vmem>>, %arg7: memref<10x24x4xbf16, #tpu.memory_space<vmem>>, %arg8: memref<10x24x128xbf16, #tpu.memory_space<vmem>>) attributes {dimension_semantics = [#tpu.dimension_semantics<parallel>], iteration_bounds = array<i64: 2>, scalar_prefetch = 0 : i64, scratch_operands = 2 : i64, tpu.core_type = #tpu.core_type<tc>, window_params = [{transform_indices = @transform_0, window_bounds = array<i64: 1, 8, 2, 8, 8>}, {pipeline_mode = #tpu.pipeline_mode<synchronous>, transform_indices = @transform_1, window_bounds = array<i64: 3, 12, 128>}, {pipeline_mode = #tpu.pipeline_mode<synchronous>, transform_indices = @transform_2, window_bounds = array<i64: 1, 128>}, {pipeline_mode = #tpu.pipeline_mode<synchronous>, transform_indices = @transform_3, window_bounds = array<i64: 3, 384, 128>}, {pipeline_mode = #tpu.pipeline_mode<synchronous>, transform_indices = @transform_4, window_bounds = array<i64: 1, 128>}, {transform_indices = @transform_5, window_bounds = array<i64: 1, 64, 128>}]} {
    %c0 = arith.constant 0 : index
    %c0_0 = arith.constant 0 : index
    %c0_1 = arith.constant 0 : index
    %c0_2 = arith.constant 0 : index
    %c0_3 = arith.constant 0 : index
    %0 = vector.load %arg1[%c0, %c0_0, %c0_1, %c0_2, %c0_3] : memref<1x8x2x8x8xbf16, #tpu.memory_space<vmem>>, vector<1x8x2x8x8xbf16>
    %1 = vector.shape_cast %0 : vector<1x8x2x8x8xbf16> to vector<8x2x8x8xbf16>
    %2 = vector.extract_strided_slice %1 {offsets = [0, 0, 0, 0], sizes = [8, 1, 8, 8], strides = [1, 1, 1, 1]} : vector<8x2x8x8xbf16> to vector<8x1x8x8xbf16>
    %3 = vector.shape_cast %2 : vector<8x1x8x8xbf16> to vector<8x8x8xbf16>
    %4 = vector.extract_strided_slice %1 {offsets = [0, 1, 0, 0], sizes = [8, 1, 8, 8], strides = [1, 1, 1, 1]} : vector<8x2x8x8xbf16> to vector<8x1x8x8xbf16>
    %5 = vector.shape_cast %4 : vector<8x1x8x8xbf16> to vector<8x8x8xbf16>
    %6 = arith.maximumf %3, %5 : vector<8x8x8xbf16>
    %7 = vector.extract_strided_slice %6 {offsets = [0, 0, 0], sizes = [8, 8, 4], strides = [1, 1, 1]} : vector<8x8x8xbf16> to vector<8x8x4xbf16>
    %8 = vector.extract_strided_slice %6 {offsets = [0, 0, 4], sizes = [8, 8, 4], strides = [1, 1, 1]} : vector<8x8x8xbf16> to vector<8x8x4xbf16>
    %9 = arith.maximumf %7, %8 : vector<8x8x4xbf16>
    %cst = arith.constant 0.000000e+00 : bf16
    %10 = vector.broadcast %cst : bf16 to vector<1x24x4xbf16>
    %c0_4 = arith.constant 0 : index
    %c0_5 = arith.constant 0 : index
    %c0_6 = arith.constant 0 : index
    %11 = vector.load %arg7[%c0_4, %c0_5, %c0_6] : memref<10x24x4xbf16, #tpu.memory_space<vmem>>, vector<1x24x4xbf16>
    tpu.vector_store %arg7[%c0_4, %c0_5, %c0_6], %10 {strides = array<i32>} : memref<10x24x4xbf16, #tpu.memory_space<vmem>>, vector<1x24x4xbf16>,
    %cst_7 = arith.constant 0.000000e+00 : bf16
    %12 = vector.broadcast %cst_7 : bf16 to vector<1x24x4xbf16>
    %c9 = arith.constant 9 : index
    %c0_8 = arith.constant 0 : index
    %c0_9 = arith.constant 0 : index
    %13 = vector.load %arg7[%c9, %c0_8, %c0_9] : memref<10x24x4xbf16, #tpu.memory_space<vmem>>, vector<1x24x4xbf16>
    tpu.vector_store %arg7[%c9, %c0_8, %c0_9], %12 {strides = array<i32>} : memref<10x24x4xbf16, #tpu.memory_space<vmem>>, vector<1x24x4xbf16>,
    %cst_10 = arith.constant 0.000000e+00 : bf16
    %14 = vector.broadcast %cst_10 : bf16 to vector<8x8x4xbf16>
    %c1 = arith.constant 1 : index
    %c0_11 = arith.constant 0 : index
    %c0_12 = arith.constant 0 : index
    %15 = vector.load %arg7[%c1, %c0_11, %c0_12] : memref<10x24x4xbf16, #tpu.memory_space<vmem>>, vector<8x8x4xbf16>
    tpu.vector_store %arg7[%c1, %c0_11, %c0_12], %14 {strides = array<i32>} : memref<10x24x4xbf16, #tpu.memory_space<vmem>>, vector<8x8x4xbf16>,
    %cst_13 = arith.constant 0.000000e+00 : bf16
    %16 = vector.broadcast %cst_13 : bf16 to vector<8x8x4xbf16>
    %c1_14 = arith.constant 1 : index
    %c16 = arith.constant 16 : index
    %c0_15 = arith.constant 0 : index
    %17 = vector.load %arg7[%c1_14, %c16, %c0_15] : memref<10x24x4xbf16, #tpu.memory_space<vmem>>, vector<8x8x4xbf16>
    tpu.vector_store %arg7[%c1_14, %c16, %c0_15], %16 {strides = array<i32>} : memref<10x24x4xbf16, #tpu.memory_space<vmem>>, vector<8x8x4xbf16>,
    %c1_16 = arith.constant 1 : index
    %c8 = arith.constant 8 : index
    %c0_17 = arith.constant 0 : index
    %18 = vector.load %arg7[%c1_16, %c8, %c0_17] : memref<10x24x4xbf16, #tpu.memory_space<vmem>>, vector<8x8x4xbf16>
    tpu.vector_store %arg7[%c1_16, %c8, %c0_17], %9 {strides = array<i32>} : memref<10x24x4xbf16, #tpu.memory_space<vmem>>, vector<8x8x4xbf16>,
    %cst_18 = arith.constant 0.000000e+00 : f32
    %19 = vector.broadcast %cst_18 : f32 to vector<64x128xf32>
    %c0_19 = arith.constant 0 : index
    %c7 = arith.constant 7 : index
    %c0_20 = arith.constant 0 : index
    %20 = vector.load %arg7[%c0_19, %c7, %c0_20] : memref<10x24x4xbf16, #tpu.memory_space<vmem>>, vector<10x8x4xbf16>
    %21 = vector.extract_strided_slice %20 {offsets = [0, 0, 0], sizes = [8, 8, 4], strides = [1, 1, 1]} : vector<10x8x4xbf16> to vector<8x8x4xbf16>
    %22 = vector.extract_strided_slice %20 {offsets = [1, 0, 0], sizes = [8, 8, 4], strides = [1, 1, 1]} : vector<10x8x4xbf16> to vector<8x8x4xbf16>
    %23 = vector.extract_strided_slice %20 {offsets = [2, 0, 0], sizes = [8, 8, 4], strides = [1, 1, 1]} : vector<10x8x4xbf16> to vector<8x8x4xbf16>
    %24 = tpu.concatenate %21, %22, %23 in 2 : vector<8x8x4xbf16>, vector<8x8x4xbf16>, vector<8x8x4xbf16> -> vector<8x8x12xbf16>
    %25 = vector.shape_cast %24 : vector<8x8x12xbf16> to vector<64x12xbf16>
    %c0_21 = arith.constant 0 : index
    %c0_22 = arith.constant 0 : index
    %c0_23 = arith.constant 0 : index
    %26 = vector.load %arg2[%c0_21, %c0_22, %c0_23] : memref<3x12x128xbf16, #tpu.memory_space<vmem>>, vector<1x12x128xbf16>
    %27 = vector.shape_cast %26 : vector<1x12x128xbf16> to vector<12x128xbf16>
    %cst_24 = arith.constant dense<0.000000e+00> : vector<64x128xf32>
    %28 = tpu.matmul %25, %27, %cst_24 {dimension_numbers = #tpu.dot_dimension_numbers<[1], [0], [0], [1], [0, 0, 1, 1], [], []>} : vector<64x12xbf16>, vector<12x128xbf16>, vector<64x128xf32> -> vector<64x128xf32>
    %29 = arith.addf %19, %28 : vector<64x128xf32>
    %c0_25 = arith.constant 0 : index
    %c8_26 = arith.constant 8 : index
    %c0_27 = arith.constant 0 : index
    %30 = vector.load %arg7[%c0_25, %c8_26, %c0_27] : memref<10x24x4xbf16, #tpu.memory_space<vmem>>, vector<10x8x4xbf16>
    %31 = vector.extract_strided_slice %30 {offsets = [0, 0, 0], sizes = [8, 8, 4], strides = [1, 1, 1]} : vector<10x8x4xbf16> to vector<8x8x4xbf16>
    %32 = vector.extract_strided_slice %30 {offsets = [1, 0, 0], sizes = [8, 8, 4], strides = [1, 1, 1]} : vector<10x8x4xbf16> to vector<8x8x4xbf16>
    %33 = vector.extract_strided_slice %30 {offsets = [2, 0, 0], sizes = [8, 8, 4], strides = [1, 1, 1]} : vector<10x8x4xbf16> to vector<8x8x4xbf16>
    %34 = tpu.concatenate %31, %32, %33 in 2 : vector<8x8x4xbf16>, vector<8x8x4xbf16>, vector<8x8x4xbf16> -> vector<8x8x12xbf16>
    %35 = vector.shape_cast %34 : vector<8x8x12xbf16> to vector<64x12xbf16>
    %c1_28 = arith.constant 1 : index
    %c0_29 = arith.constant 0 : index
    %c0_30 = arith.constant 0 : index
    %36 = vector.load %arg2[%c1_28, %c0_29, %c0_30] : memref<3x12x128xbf16, #tpu.memory_space<vmem>>, vector<1x12x128xbf16>
    %37 = vector.shape_cast %36 : vector<1x12x128xbf16> to vector<12x128xbf16>
    %cst_31 = arith.constant dense<0.000000e+00> : vector<64x128xf32>
    %38 = tpu.matmul %35, %37, %cst_31 {dimension_numbers = #tpu.dot_dimension_numbers<[1], [0], [0], [1], [0, 0, 1, 1], [], []>} : vector<64x12xbf16>, vector<12x128xbf16>, vector<64x128xf32> -> vector<64x128xf32>
    %39 = arith.addf %29, %38 : vector<64x128xf32>
    %c0_32 = arith.constant 0 : index
    %c9_33 = arith.constant 9 : index
    %c0_34 = arith.constant 0 : index
    %40 = vector.load %arg7[%c0_32, %c9_33, %c0_34] : memref<10x24x4xbf16, #tpu.memory_space<vmem>>, vector<10x8x4xbf16>
    %41 = vector.extract_strided_slice %40 {offsets = [0, 0, 0], sizes = [8, 8, 4], strides = [1, 1, 1]} : vector<10x8x4xbf16> to vector<8x8x4xbf16>
    %42 = vector.extract_strided_slice %40 {offsets = [1, 0, 0], sizes = [8, 8, 4], strides = [1, 1, 1]} : vector<10x8x4xbf16> to vector<8x8x4xbf16>
    %43 = vector.extract_strided_slice %40 {offsets = [2, 0, 0], sizes = [8, 8, 4], strides = [1, 1, 1]} : vector<10x8x4xbf16> to vector<8x8x4xbf16>
    %44 = tpu.concatenate %41, %42, %43 in 2 : vector<8x8x4xbf16>, vector<8x8x4xbf16>, vector<8x8x4xbf16> -> vector<8x8x12xbf16>
    %45 = vector.shape_cast %44 : vector<8x8x12xbf16> to vector<64x12xbf16>
    %c2 = arith.constant 2 : index
    %c0_35 = arith.constant 0 : index
    %c0_36 = arith.constant 0 : index
    %46 = vector.load %arg2[%c2, %c0_35, %c0_36] : memref<3x12x128xbf16, #tpu.memory_space<vmem>>, vector<1x12x128xbf16>
    %47 = vector.shape_cast %46 : vector<1x12x128xbf16> to vector<12x128xbf16>
    %cst_37 = arith.constant dense<0.000000e+00> : vector<64x128xf32>
    %48 = tpu.matmul %45, %47, %cst_37 {dimension_numbers = #tpu.dot_dimension_numbers<[1], [0], [0], [1], [0, 0, 1, 1], [], []>} : vector<64x12xbf16>, vector<12x128xbf16>, vector<64x128xf32> -> vector<64x128xf32>
    %49 = arith.addf %39, %48 : vector<64x128xf32>
    %c0_38 = arith.constant 0 : index
    %c0_39 = arith.constant 0 : index
    %50 = vector.load %arg3[%c0_38, %c0_39] : memref<1x128xf32, #tpu.memory_space<vmem>>, vector<1x128xf32>
    %51 = vector.broadcast %50 : vector<1x128xf32> to vector<64x128xf32>
    %52 = arith.addf %49, %51 : vector<64x128xf32>
    %cst_40 = arith.constant 0.000000e+00 : f32
    %53 = vector.broadcast %cst_40 : f32 to vector<64x128xf32>
    %54 = arith.maximumf %52, %53 : vector<64x128xf32>
    %55 = arith.truncf %54 : vector<64x128xf32> to vector<64x128xbf16>
    %56 = vector.shape_cast %55 : vector<64x128xbf16> to vector<8x8x128xbf16>
    %cst_41 = arith.constant 0.000000e+00 : bf16
    %57 = vector.broadcast %cst_41 : bf16 to vector<1x24x128xbf16>
    %c0_42 = arith.constant 0 : index
    %c0_43 = arith.constant 0 : index
    %c0_44 = arith.constant 0 : index
    %58 = vector.load %arg8[%c0_42, %c0_43, %c0_44] : memref<10x24x128xbf16, #tpu.memory_space<vmem>>, vector<1x24x128xbf16>
    tpu.vector_store %arg8[%c0_42, %c0_43, %c0_44], %57 {strides = array<i32>} : memref<10x24x128xbf16, #tpu.memory_space<vmem>>, vector<1x24x128xbf16>,
    %cst_45 = arith.constant 0.000000e+00 : bf16
    %59 = vector.broadcast %cst_45 : bf16 to vector<1x24x128xbf16>
    %c9_46 = arith.constant 9 : index
    %c0_47 = arith.constant 0 : index
    %c0_48 = arith.constant 0 : index
    %60 = vector.load %arg8[%c9_46, %c0_47, %c0_48] : memref<10x24x128xbf16, #tpu.memory_space<vmem>>, vector<1x24x128xbf16>
    tpu.vector_store %arg8[%c9_46, %c0_47, %c0_48], %59 {strides = array<i32>} : memref<10x24x128xbf16, #tpu.memory_space<vmem>>, vector<1x24x128xbf16>,
    %cst_49 = arith.constant 0.000000e+00 : bf16
    %61 = vector.broadcast %cst_49 : bf16 to vector<8x8x128xbf16>
    %c1_50 = arith.constant 1 : index
    %c0_51 = arith.constant 0 : index
    %c0_52 = arith.constant 0 : index
    %62 = vector.load %arg8[%c1_50, %c0_51, %c0_52] : memref<10x24x128xbf16, #tpu.memory_space<vmem>>, vector<8x8x128xbf16>
    tpu.vector_store %arg8[%c1_50, %c0_51, %c0_52], %61 {strides = array<i32>} : memref<10x24x128xbf16, #tpu.memory_space<vmem>>, vector<8x8x128xbf16>,
    %cst_53 = arith.constant 0.000000e+00 : bf16
    %63 = vector.broadcast %cst_53 : bf16 to vector<8x8x128xbf16>
    %c1_54 = arith.constant 1 : index
    %c16_55 = arith.constant 16 : index
    %c0_56 = arith.constant 0 : index
    %64 = vector.load %arg8[%c1_54, %c16_55, %c0_56] : memref<10x24x128xbf16, #tpu.memory_space<vmem>>, vector<8x8x128xbf16>
    tpu.vector_store %arg8[%c1_54, %c16_55, %c0_56], %63 {strides = array<i32>} : memref<10x24x128xbf16, #tpu.memory_space<vmem>>, vector<8x8x128xbf16>,
    %c1_57 = arith.constant 1 : index
    %c8_58 = arith.constant 8 : index
    %c0_59 = arith.constant 0 : index
    %65 = vector.load %arg8[%c1_57, %c8_58, %c0_59] : memref<10x24x128xbf16, #tpu.memory_space<vmem>>, vector<8x8x128xbf16>
    tpu.vector_store %arg8[%c1_57, %c8_58, %c0_59], %56 {strides = array<i32>} : memref<10x24x128xbf16, #tpu.memory_space<vmem>>, vector<8x8x128xbf16>,
    %cst_60 = arith.constant 0.000000e+00 : f32
    %66 = vector.broadcast %cst_60 : f32 to vector<64x128xf32>
    %c0_61 = arith.constant 0 : index
    %c7_62 = arith.constant 7 : index
    %c0_63 = arith.constant 0 : index
    %67 = vector.load %arg8[%c0_61, %c7_62, %c0_63] : memref<10x24x128xbf16, #tpu.memory_space<vmem>>, vector<10x8x128xbf16>
    %68 = vector.extract_strided_slice %67 {offsets = [0, 0, 0], sizes = [8, 8, 128], strides = [1, 1, 1]} : vector<10x8x128xbf16> to vector<8x8x128xbf16>
    %69 = vector.extract_strided_slice %67 {offsets = [1, 0, 0], sizes = [8, 8, 128], strides = [1, 1, 1]} : vector<10x8x128xbf16> to vector<8x8x128xbf16>
    %70 = vector.extract_strided_slice %67 {offsets = [2, 0, 0], sizes = [8, 8, 128], strides = [1, 1, 1]} : vector<10x8x128xbf16> to vector<8x8x128xbf16>
    %71 = tpu.concatenate %68, %69, %70 in 2 : vector<8x8x128xbf16>, vector<8x8x128xbf16>, vector<8x8x128xbf16> -> vector<8x8x384xbf16>
    %72 = vector.shape_cast %71 : vector<8x8x384xbf16> to vector<64x384xbf16>
    %c0_64 = arith.constant 0 : index
    %c0_65 = arith.constant 0 : index
    %c0_66 = arith.constant 0 : index
    %73 = vector.load %arg4[%c0_64, %c0_65, %c0_66] : memref<3x384x128xbf16, #tpu.memory_space<vmem>>, vector<1x384x128xbf16>
    %74 = vector.shape_cast %73 : vector<1x384x128xbf16> to vector<384x128xbf16>
    %cst_67 = arith.constant dense<0.000000e+00> : vector<64x128xf32>
    %75 = tpu.matmul %72, %74, %cst_67 {dimension_numbers = #tpu.dot_dimension_numbers<[1], [0], [0], [1], [0, 0, 1, 1], [], []>} : vector<64x384xbf16>, vector<384x128xbf16>, vector<64x128xf32> -> vector<64x128xf32>
    %76 = arith.addf %66, %75 : vector<64x128xf32>
    %c0_68 = arith.constant 0 : index
    %c8_69 = arith.constant 8 : index
    %c0_70 = arith.constant 0 : index
    %77 = vector.load %arg8[%c0_68, %c8_69, %c0_70] : memref<10x24x128xbf16, #tpu.memory_space<vmem>>, vector<10x8x128xbf16>
    %78 = vector.extract_strided_slice %77 {offsets = [0, 0, 0], sizes = [8, 8, 128], strides = [1, 1, 1]} : vector<10x8x128xbf16> to vector<8x8x128xbf16>
    %79 = vector.extract_strided_slice %77 {offsets = [1, 0, 0], sizes = [8, 8, 128], strides = [1, 1, 1]} : vector<10x8x128xbf16> to vector<8x8x128xbf16>
    %80 = vector.extract_strided_slice %77 {offsets = [2, 0, 0], sizes = [8, 8, 128], strides = [1, 1, 1]} : vector<10x8x128xbf16> to vector<8x8x128xbf16>
    %81 = tpu.concatenate %78, %79, %80 in 2 : vector<8x8x128xbf16>, vector<8x8x128xbf16>, vector<8x8x128xbf16> -> vector<8x8x384xbf16>
    %82 = vector.shape_cast %81 : vector<8x8x384xbf16> to vector<64x384xbf16>
    %c1_71 = arith.constant 1 : index
    %c0_72 = arith.constant 0 : index
    %c0_73 = arith.constant 0 : index
    %83 = vector.load %arg4[%c1_71, %c0_72, %c0_73] : memref<3x384x128xbf16, #tpu.memory_space<vmem>>, vector<1x384x128xbf16>
    %84 = vector.shape_cast %83 : vector<1x384x128xbf16> to vector<384x128xbf16>
    %cst_74 = arith.constant dense<0.000000e+00> : vector<64x128xf32>
    %85 = tpu.matmul %82, %84, %cst_74 {dimension_numbers = #tpu.dot_dimension_numbers<[1], [0], [0], [1], [0, 0, 1, 1], [], []>} : vector<64x384xbf16>, vector<384x128xbf16>, vector<64x128xf32> -> vector<64x128xf32>
    %86 = arith.addf %76, %85 : vector<64x128xf32>
    %c0_75 = arith.constant 0 : index
    %c9_76 = arith.constant 9 : index
    %c0_77 = arith.constant 0 : index
    %87 = vector.load %arg8[%c0_75, %c9_76, %c0_77] : memref<10x24x128xbf16, #tpu.memory_space<vmem>>, vector<10x8x128xbf16>
    %88 = vector.extract_strided_slice %87 {offsets = [0, 0, 0], sizes = [8, 8, 128], strides = [1, 1, 1]} : vector<10x8x128xbf16> to vector<8x8x128xbf16>
    %89 = vector.extract_strided_slice %87 {offsets = [1, 0, 0], sizes = [8, 8, 128], strides = [1, 1, 1]} : vector<10x8x128xbf16> to vector<8x8x128xbf16>
    %90 = vector.extract_strided_slice %87 {offsets = [2, 0, 0], sizes = [8, 8, 128], strides = [1, 1, 1]} : vector<10x8x128xbf16> to vector<8x8x128xbf16>
    %91 = tpu.concatenate %88, %89, %90 in 2 : vector<8x8x128xbf16>, vector<8x8x128xbf16>, vector<8x8x128xbf16> -> vector<8x8x384xbf16>
    %92 = vector.shape_cast %91 : vector<8x8x384xbf16> to vector<64x384xbf16>
    %c2_78 = arith.constant 2 : index
    %c0_79 = arith.constant 0 : index
    %c0_80 = arith.constant 0 : index
    %93 = vector.load %arg4[%c2_78, %c0_79, %c0_80] : memref<3x384x128xbf16, #tpu.memory_space<vmem>>, vector<1x384x128xbf16>
    %94 = vector.shape_cast %93 : vector<1x384x128xbf16> to vector<384x128xbf16>
    %cst_81 = arith.constant dense<0.000000e+00> : vector<64x128xf32>
    %95 = tpu.matmul %92, %94, %cst_81 {dimension_numbers = #tpu.dot_dimension_numbers<[1], [0], [0], [1], [0, 0, 1, 1], [], []>} : vector<64x384xbf16>, vector<384x128xbf16>, vector<64x128xf32> -> vector<64x128xf32>
    %96 = arith.addf %86, %95 : vector<64x128xf32>
    %c0_82 = arith.constant 0 : index
    %c0_83 = arith.constant 0 : index
    %97 = vector.load %arg5[%c0_82, %c0_83] : memref<1x128xf32, #tpu.memory_space<vmem>>, vector<1x128xf32>
    %98 = vector.broadcast %97 : vector<1x128xf32> to vector<64x128xf32>
    %99 = arith.addf %96, %98 : vector<64x128xf32>
    %cst_84 = arith.constant 0.000000e+00 : f32
    %100 = vector.broadcast %cst_84 : f32 to vector<64x128xf32>
    %101 = arith.maximumf %99, %100 : vector<64x128xf32>
    %c0_85 = arith.constant 0 : index
    %c0_86 = arith.constant 0 : index
    %c0_87 = arith.constant 0 : index
    %102 = vector.load %arg6[%c0_85, %c0_86, %c0_87] : memref<1x64x128xf32, #tpu.memory_space<vmem>>, vector<1x64x128xf32>
    %103 = vector.shape_cast %102 : vector<1x64x128xf32> to vector<64x128xf32>
    %104 = vector.shape_cast %101 : vector<64x128xf32> to vector<1x64x128xf32>
    tpu.vector_store %arg6[%c0_85, %c0_86, %c0_87], %104 {strides = array<i32>} : memref<1x64x128xf32, #tpu.memory_space<vmem>>, vector<1x64x128xf32>,
    return
  }
  func.func @transform_0(%arg0: i32) -> (i32, i32, i32, i32, i32) {
    %c0_i32 = arith.constant 0 : i32
    %c0_i32_0 = arith.constant 0 : i32
    %c0_i32_1 = arith.constant 0 : i32
    %c0_i32_2 = arith.constant 0 : i32
    %c0_i32_3 = arith.constant 0 : i32
    return %arg0, %c0_i32, %c0_i32_0, %c0_i32_1, %c0_i32_2 : i32, i32, i32, i32, i32
  }
  func.func @transform_1(%arg0: i32) -> (i32, i32, i32) {
    %c0_i32 = arith.constant 0 : i32
    %c0_i32_0 = arith.constant 0 : i32
    %c0_i32_1 = arith.constant 0 : i32
    %c0_i32_2 = arith.constant 0 : i32
    return %c0_i32, %c0_i32_0, %c0_i32_1 : i32, i32, i32
  }
  func.func @transform_2(%arg0: i32) -> (i32, i32) {
    %c0_i32 = arith.constant 0 : i32
    %c0_i32_0 = arith.constant 0 : i32
    %c0_i32_1 = arith.constant 0 : i32
    return %c0_i32, %c0_i32_0 : i32, i32
  }
  func.func @transform_3(%arg0: i32) -> (i32, i32, i32) {
    %c0_i32 = arith.constant 0 : i32
    %c0_i32_0 = arith.constant 0 : i32
    %c0_i32_1 = arith.constant 0 : i32
    %c0_i32_2 = arith.constant 0 : i32
    return %c0_i32, %c0_i32_0, %c0_i32_1 : i32, i32, i32
  }
  func.func @transform_4(%arg0: i32) -> (i32, i32) {
    %c0_i32 = arith.constant 0 : i32
    %c0_i32_0 = arith.constant 0 : i32
    %c0_i32_1 = arith.constant 0 : i32
    return %c0_i32, %c0_i32_0 : i32, i32
  }
  func.func @transform_5(%arg0: i32) -> (i32, i32, i32) {
    %c0_i32 = arith.constant 0 : i32
    %c0_i32_0 = arith.constant 0 : i32
    %c0_i32_1 = arith.constant 0 : i32
    return %arg0, %c0_i32, %c0_i32_0 : i32, i32, i32
  }
}

</mosaic_0001>

<bundles_post_ra>
// kernel: down_forward.1
= control target key start
LH: loop header
LB: loop body
LE: loop exit
PB: predicated region body
PF: predicated region fallthrough
CT: control target
= control target key end

     0   :  { %s3655_s18 = smov 0   ;;  %s4690_s0 = inlined_call_operand.vmem [shape: bf16[2,8,2,8,8], index: 0, kind: input, shape index: {}]   ;;  %s4691_s1 = inlined_call_operand.vmem [shape: bf16[3,12,128], index: 1, kind: input, shape index: {}]   ;;  %s4692_s2 = inlined_call_operand.vmem [shape: f32[1,128], index: 2, kind: input, shape index: {}]   ;;  %s4693_s3 = inlined_call_operand.vmem [shape: bf16[3,384,128], index: 3, kind: input, shape index: {}]   ;;  %s4694_s4 = inlined_call_operand.vmem [shape: f32[1,128], index: 4, kind: input, shape index: {}]   ;;  %s4695_s5 = inlined_call_operand.vmem [shape: f32[2,64,128], index: 5, kind: output, shape index: {}]  }
   0x1 LB: > { %s2953_s19 = sadd.s32 4294967295, %s3619_s18   ;;  %p2957_p0 = scmp.ge.s32.totalorder %s3619_s18, 1  ;;  %s3619_s18 = sphi %s3655_s18, %s15_s18  }
   0x2   : > { %p187_p1 = scmp.lt.s32.totalorder %s3619_s18, 3 }
   0x4   : > { %p188_p2 = pnand %p2957_p0, %p187_p1 }
   0x5   : > { %p215_p3 = scmp.lt.s32.totalorder (!%p188_p2), %s2953_s19, 1  ;;  %s3621_s24 = smov (!%p188_p2), 124  }
   0x6   : > { %191 = sbr.rel (%p188_p2) target bundleno = 806 (0x326), region = 40  ;;  %s3623_s25 = smov (!%p188_p2), 8  }
   0x7   : > { %s3624_s26 = smov (!%p188_p2), 4  }
   0xb   : > { %s4701_s19 = smov (!%p215_p3, %s2953_s19), 1  ;;  %vm330_vm0 = vcmask 27648   ;;  %v3622_v36 = vmov 0   ;;  %vm778_vm1 = vcmask 1045504   ;;  %vm465_vm2 = vcmask 31744  }
   0xc   : > { %s3444_s20 = sshll.u32 %s4701_s19, 6  ;;  %336 = vst.msk [vmem:[#allocation2 + $0x70] sm:$0xf] %vm330_vm0, %v3622_v36  ;;  %vm490_vm3 = vcmask 64512   ;;  %vm1054_vm4 = vsmask.f32 3328 }
   0xd   : > { %s219_s23 = scalar_lea.vmem %s4690_s0, %s3444_s20  ;;  %337 = vst.msk [vmem:[#allocation2 + $0x74] sm:$0xf] %vm330_vm0, %v3622_v36  ;;  %vm1055_vm5 = vsmask.f32 7440  ;;  %vm765_vm7 = vcmask 97280   ;;  %s4653_s10 = scalar_lea.vmem %s4695_s5, %s3444_s20 }
   0xe   : > { %v3533_v0 = vld [vmem:[%s219_s23] sm:$0xff]   ;;  %v3564_v1 = vld [vmem:[%s219_s23 + $0x8] sm:$0xff]   ;;  %v3565_v2 = vld [vmem:[%s219_s23 + $0x10] sm:$0xff]   ;;  %331 = vst.msk [vmem:[#allocation2] sm:$0xf] %vm330_vm0, %v3622_v36 }
   0xf   : > { %v3534_v3 = vunpack.c.l.bf16 %v3533_v0  ;;  %v3535_v4 = vunpack.c.h.bf16 %v3533_v0  ;;  %v3538_v5 = vunpack.c.l.bf16 %v3564_v1  ;;  %v3539_v6 = vunpack.c.h.bf16 %v3564_v1  ;;  %v3566_v7 = vld [vmem:[%s219_s23 + $0x18] sm:$0xff]   ;;  %v3567_v8 = vld [vmem:[%s219_s23 + $0x20] sm:$0xff]   ;;  %v3568_v9 = vld [vmem:[%s219_s23 + $0x28] sm:$0xff]   ;;  %332 = vst.msk [vmem:[#allocation2 + $0x4] sm:$0xf] %vm330_vm0, %v3622_v36 }
  0x10   : > { %v3542_v10 = vunpack.c.l.bf16 %v3565_v2  ;;  %v3543_v11 = vunpack.c.h.bf16 %v3565_v2  ;;  %v3546_v12 = vunpack.c.l.bf16 %v3566_v7  ;;  %v3547_v13 = vunpack.c.h.bf16 %v3566_v7  ;;  %v3569_v14 = vld [vmem:[%s219_s23 + $0x30] sm:$0xff]   ;;  %v3570_v23 = vld [vmem:[%s219_s23 + $0x38] sm:$0xff]   ;;  %333 = vst.msk [vmem:[#allocation2 + $0x8] sm:$0xf] %vm330_vm0, %v3622_v36  ;;  %vm3925_vm6 = vmor %vm1054_vm4, %vm1055_vm5 }
  0x11   : > { %v3671_v15 = vmax.f32 %v3534_v3, %v3535_v4  ;;  %v3673_v16 = vmax.f32 %v3538_v5, %v3539_v6  ;;  %v3550_v17 = vunpack.c.l.bf16 %v3567_v8  ;;  %v3551_v18 = vunpack.c.h.bf16 %v3567_v8  ;;  %335 = vst.msk [vmem:[#allocation2 + $0x6c] sm:$0xf] %vm330_vm0, %v3622_v36 }
  0x12   : > { %v3675_v19 = vmax.f32 %v3542_v10, %v3543_v11  ;;  %v3677_v20 = vmax.f32 %v3546_v12, %v3547_v13  ;;  %v3554_v21 = vunpack.c.l.bf16 %v3568_v9  ;;  %v3555_v22 = vunpack.c.h.bf16 %v3568_v9  ;;  %339 = vst.msk [vmem:[#allocation2 + $0xc] sm:$0xf] %vm330_vm0, %v3622_v36 }
  0x13   : > { %v3679_v24 = vmax.f32 %v3550_v17, %v3551_v18  ;;  %v3558_v25 = vunpack.c.l.bf16 %v3569_v14  ;;  %v3559_v27 = vunpack.c.h.bf16 %v3569_v14  ;;  %v3562_v28 = vunpack.c.l.bf16 %v3570_v23  ;;  %v3030_v37 = vld [vmem:[#allocation2 + $0x70] sm:$0xf]  ;;  %340 = vst.msk [vmem:[#allocation2 + $0x18] sm:$0xf] %vm330_vm0, %v3622_v36 }
  0x14   : > { %v3681_v26 = vmax.f32 %v3554_v21, %v3555_v22  ;;  %v3563_v29 = vunpack.c.h.bf16 %v3570_v23  ;;  %v3591_v30 = vpack.i.bf16 %v3673_v16, %v3671_v15  ;;  %v3596_v34 = vpack.i.bf16 %v3677_v20, %v3675_v19  ;;  %v3458_v38 = vld [vmem:[#allocation2 + $0x70] sm:$0x10]  ;;  %341 = vst.msk [vmem:[#allocation2 + $0x24] sm:$0xf] %vm330_vm0, %v3622_v36 }
  0x15   : > { %v3685_v31 = vmax.f32 %v3558_v25, %v3559_v27  ;;  %v3031_v39 = vor.u32 %v3458_v38, %v3030_v37  ;;  %342 = vst.msk [vmem:[#allocation2 + $0x30] sm:$0xf] %vm330_vm0, %v3622_v36  ;;  %vm547_vm8 = vsmask.f32 256  ;;  %vm548_vm9 = vsmask.f32 4368 }
  0x16   : > { %v3687_v32 = vmax.f32 %v3562_v28, %v3563_v29  ;;  %3592 = vrot.lane.b32.xlu0 %v3591_v30, %s3621_s24  ;;  %v3601_v33 = vpack.i.bf16 %v3681_v26, %v3679_v24  ;;  %343 = vst.msk [vmem:[#allocation2 + $0x3c] sm:$0xf] %vm330_vm0, %v3622_v36  ;;  %vm4013_vm10 = vmor %vm547_vm8, %vm548_vm9 }
  0x17   : > { %972 = vrot.lane.b32.xlu2 %v3031_v39, %s3623_s25  ;;  %344 = vst.msk [vmem:[#allocation2 + $0x48] sm:$0xf] %vm330_vm0, %v3622_v36 }
  0x18   : > { %3602 = vrot.lane.b32.xlu1 %v3601_v33, %s3621_s24  ;;  %v3606_v35 = vpack.i.bf16 %v3687_v32, %v3685_v31  ;;  %345 = vst.msk [vmem:[#allocation2 + $0x54] sm:$0xf] %vm330_vm0, %v3622_v36 }
  0x19   : > { %346 = vst.msk [vmem:[#allocation2 + $0x60] sm:$0xf] %vm330_vm0, %v3622_v36 }
  0x1a   : > { %347 = vst.msk [vmem:[#allocation2 + $0x14] sm:$0xf] %vm330_vm0, %v3622_v36  ;;  %v367_v22 = vld [vmem:[#allocation2 + $0x18] sm:$0x8] }
  0x1b   : > { %348 = vst.msk [vmem:[#allocation2 + $0x20] sm:$0xf] %vm330_vm0, %v3622_v36 }
  0x1c   : > { %349 = vst.msk [vmem:[#allocation2 + $0x2c] sm:$0xf] %vm330_vm0, %v3622_v36 }
  0x1d   : > { %350 = vst.msk [vmem:[#allocation2 + $0x38] sm:$0xf] %vm330_vm0, %v3622_v36 }
  0x1e   : > { %3597 = vrot.lane.b32.xlu0 %v3596_v34, %s3621_s24  ;;  %351 = vst.msk [vmem:[#allocation2 + $0x44] sm:$0xf] %vm330_vm0, %v3622_v36 }
  0x1f   : > { %352 = vst.msk [vmem:[#allocation2 + $0x50] sm:$0xf] %vm330_vm0, %v3622_v36 }
  0x20   : > { %3607 = vrot.lane.b32.xlu1 %v3606_v35, %s3621_s24  ;;  %353 = vst.msk [vmem:[#allocation2 + $0x5c] sm:$0xf] %vm330_vm0, %v3622_v36  ;;  %v369_v35 = vld [vmem:[#allocation2 + $0x24] sm:$0x8] }
  0x21   : > { %354 = vst.msk [vmem:[#allocation2 + $0x68] sm:$0xf] %vm330_vm0, %v3622_v36  ;;  %v3450_v1 = vld [vmem:[#allocation2 + $0x10] sm:$0x10]  ;;  %v405_v37 = vunpack.c.l.b16 %v369_v35 }
  0x22   : > { %1269 = vst [vmem:[#allocation3] sm:$0xf] %v3622_v36  ;;  %v3451_v59 = vld [vmem:[#allocation2 + $0x1c] sm:$0x10] }
  0x23   : > { %1270 = vst [vmem:[#allocation3 + $0x4] sm:$0xf] %v3622_v36  ;;  %v3452_v10 = vld [vmem:[#allocation2 + $0x28] sm:$0x10] }
  0x24   : > { %1271 = vst [vmem:[#allocation3 + $0x8] sm:$0xf] %v3622_v36 }
  0x25   : > { %1273 = vst [vmem:[#allocation3 + $0x6c] sm:$0xf] %v3622_v36  ;;  %v3454_v14 = vld [vmem:[#allocation2 + $0x40] sm:$0x10] }
  0x26   : > { %1274 = vst [vmem:[#allocation3 + $0x70] sm:$0xf] %v3622_v36  ;;  %v3455_v29 = vld [vmem:[#allocation2 + $0x4c] sm:$0x10] }
  0x27   : > { %1275 = vst [vmem:[#allocation3 + $0x74] sm:$0xf] %v3622_v36 }
  0x28   : > { %1277 = vst [vmem:[#allocation3 + $0xc] sm:$0xf] %v3622_v36 }
  0x29   : > { %1278 = vst [vmem:[#allocation3 + $0x18] sm:$0xf] %v3622_v36 }
  0x2a   : > { %1279 = vst [vmem:[#allocation3 + $0x24] sm:$0xf] %v3622_v36 }
  0x2b   : > { %1280 = vst [vmem:[#allocation3 + $0x30] sm:$0xf] %v3622_v36 }
  0x2c   : > { %1281 = vst [vmem:[#allocation3 + $0x3c] sm:$0xf] %v3622_v36 }
  0x2d   : > { %1282 = vst [vmem:[#allocation3 + $0x48] sm:$0xf] %v3622_v36 }
  0x2e   : > { %1283 = vst [vmem:[#allocation3 + $0x54] sm:$0xf] %v3622_v36 }
  0x2f   : > { %1284 = vst [vmem:[#allocation3 + $0x60] sm:$0xf] %v3622_v36 }
  0x30   : > { %1285 = vst [vmem:[#allocation3 + $0x14] sm:$0xf] %v3622_v36 }
  0x31   : > { %1286 = vst [vmem:[#allocation3 + $0x20] sm:$0xf] %v3622_v36 }
  0x32   : > { %1287 = vst [vmem:[#allocation3 + $0x2c] sm:$0xf] %v3622_v36 }
  0x33   : > { %1288 = vst [vmem:[#allocation3 + $0x38] sm:$0xf] %v3622_v36 }
  0x34   : > { %1289 = vst [vmem:[#allocation3 + $0x44] sm:$0xf] %v3622_v36 }
  0x35   : > { %1290 = vst [vmem:[#allocation3 + $0x50] sm:$0xf] %v3622_v36 }
  0x36   : > { %1291 = vst [vmem:[#allocation3 + $0x5c] sm:$0xf] %v3622_v36 }
  0x37   : > { %1292 = vst [vmem:[#allocation3 + $0x68] sm:$0xf] %v3622_v36 }
  0x88   : > { %v3593_v40 = vpop.permute.xlu0 %3592 }
  0x89   : > { %v3595_v41 = vunpack.i.h.bf16 %v3593_v40  ;;  %v3594_v42 = vunpack.i.l.bf16 %v3593_v40 }
  0x8a   : > { %v3603_v45 = vpop.permute.xlu1 %3602 }
  0x8b   : > { %v315_v43 = vmax.f32 %v3673_v16, %v3595_v41  ;;  %v314_v44 = vmax.f32 %v3671_v15, %v3594_v42  ;;  %v3605_v46 = vunpack.i.h.bf16 %v3603_v45  ;;  %v3604_v49 = vunpack.i.l.bf16 %v3603_v45  ;;  %v3453_v16 = vld [vmem:[#allocation2 + $0x34] sm:$0x10]  ;;  %v3457_v42 = vld [vmem:[#allocation2 + $0x64] sm:$0x10]  ;;  %v371_v45 = vld [vmem:[#allocation2 + $0x30] sm:$0x8] }
  0x8d   : > { %v323_v47 = vpack.c.bf16 %v315_v43, %v315_v43  ;;  %v322_v48 = vpack.c.bf16 %v314_v44, %v314_v44  ;;  %v319_v50 = vmax.f32 %v3681_v26, %v3605_v46  ;;  %v318_v54 = vmax.f32 %v3679_v24, %v3604_v49  ;;  %v365_v24 = vld [vmem:[#allocation2 + $0xc] sm:$0x8] }
  0x8e   : > { %v403_v26 = vunpack.c.l.b16 %v367_v22  ;;  %v401_v30 = vunpack.c.l.b16 %v365_v24  ;;  %v3036_v22 = vld [vmem:[%s4691_s1 + $0x10] sm:$0xf]  ;;  %v3459_v24 = vld [vmem:[%s4691_s1 + $0x10] sm:$0x30] }
  0x8f   : > { %356 = vst.msk [vmem:[#allocation2 + $0x1c] sm:$0xf] %vm330_vm0, %v323_v47  ;;  %v327_v55 = vpack.c.bf16 %v319_v50, %v319_v50  ;;  %v326_v0 = vpack.c.bf16 %v318_v54, %v318_v54  ;;  %v407_v47 = vunpack.c.l.b16 %v371_v45  ;;  %v373_v50 = vld [vmem:[#allocation2 + $0x3c] sm:$0x8] }
  0x90   : > { %355 = vst.msk [vmem:[#allocation2 + $0x10] sm:$0xf] %vm330_vm0, %v322_v48  ;;  %v3598_v51 = vpop.permute.xlu0 %3597 }
  0x91   : > { %v3600_v52 = vunpack.i.h.bf16 %v3598_v51  ;;  %v3599_v53 = vunpack.i.l.bf16 %v3598_v51  ;;  %360 = vst.msk [vmem:[#allocation2 + $0x4c] sm:$0xf] %vm330_vm0, %v327_v55 }
  0x92   : > { %v3608_v58 = vpop.permute.xlu1 %3607  ;;  %359 = vst.msk [vmem:[#allocation2 + $0x40] sm:$0xf] %vm330_vm0, %v326_v0 }
  0x93   : > { %v317_v56 = vmax.f32 %v3677_v20, %v3600_v52  ;;  %v316_v57 = vmax.f32 %v3675_v19, %v3599_v53  ;;  %v3610_v60 = vunpack.i.h.bf16 %v3608_v58  ;;  %v3609_v61 = vunpack.i.l.bf16 %v3608_v58  ;;  %v3456_v20 = vld [vmem:[#allocation2 + $0x58] sm:$0x10] }
  0x94   : > { %v409_v52 = vunpack.c.l.b16 %v373_v50 }
  0x95   : > { %v325_v62 = vpack.c.bf16 %v317_v56, %v317_v56  ;;  %v324_v63 = vpack.c.bf16 %v316_v57, %v316_v57  ;;  %v321_v3 = vmax.f32 %v3687_v32, %v3610_v60  ;;  %v320_v4 = vmax.f32 %v3685_v31, %v3609_v61  ;;  %v375_v57 = vld [vmem:[#allocation2 + $0x48] sm:$0x8] }
  0x96   : > { %v3002_v2 = vld [vmem:[#allocation2 + $0x1c] sm:$0xf] }
  0x97   : > { %358 = vst.msk [vmem:[#allocation2 + $0x34] sm:$0xf] %vm330_vm0, %v325_v62  ;;  %v3774_v5 = vor.u32 %v3451_v59, %v3002_v2  ;;  %v2998_v6 = vld [vmem:[#allocation2 + $0x10] sm:$0xf]  ;;  %v329_v8 = vpack.c.bf16 %v321_v3, %v321_v3  ;;  %v328_v9 = vpack.c.bf16 %v320_v4, %v320_v4  ;;  %v3806_v23 = vld [vmem:[#allocation2 + $0x1c] sm:$0xf]  ;;  %v411_v59 = vunpack.c.l.b16 %v375_v57  ;;  %v3875_v62 = vpop.permute.xlu2 %972 }
  0x98   : > { %357 = vst.msk [vmem:[#allocation2 + $0x28] sm:$0xf] %vm330_vm0, %v324_v63  ;;  %v3777_v7 = vor.u32 %v3450_v1, %v2998_v6  ;;  %v3812_v25 = vld [vmem:[#allocation2 + $0x10] sm:$0xf]  ;;  %v404_v27 = vunpack.c.l.b16 %v3806_v23  ;;  %v3018_v28 = vld [vmem:[#allocation2 + $0x4c] sm:$0xf] }
  0x99   : > { %958 = vrot.lane.b32.xlu0 %v3774_v5, %s3623_s25  ;;  %362 = vst.msk [vmem:[#allocation2 + $0x64] sm:$0xf] %vm330_vm0, %v329_v8  ;;  %v3014_v13 = vld [vmem:[#allocation2 + $0x40] sm:$0xf]  ;;  %v402_v31 = vunpack.c.l.b16 %v3812_v25  ;;  %v3818_v32 = vor.u32 %v3455_v29, %v3018_v28  ;;  %v3863_v58 = vld [vmem:[#allocation2 + $0x4c] sm:$0xf] }
  0x9a   : > { %937 = vrot.lane.b32.xlu2 %v3777_v7, %s3624_s26  ;;  %361 = vst.msk [vmem:[#allocation2 + $0x58] sm:$0xf] %vm330_vm0, %v328_v9  ;;  %v3794_v17 = vor.u32 %v3454_v14, %v3014_v13  ;;  %v3820_v33 = vpack.c.b16 %v404_v27, %v403_v26  ;;  %v657_v39 = vpack.c.b16 %v404_v27, %v404_v27  ;;  %v3851_v51 = vld [vmem:[#allocation2 + $0x40] sm:$0xf]  ;;  %v412_v60 = vunpack.c.l.b16 %v3863_v58  ;;  %v377_v63 = vld [vmem:[#allocation2 + $0x54] sm:$0x8] }
  0x9b   : > { %v3822_v34 = vpack.c.b16 %v402_v31, %v401_v30  ;;  %v656_v44 = vpack.c.b16 %v402_v31, %v402_v31  ;;  %v410_v53 = vunpack.c.l.b16 %v3851_v51  ;;  %v413_v1 = vunpack.c.l.b16 %v377_v63  ;;  %v379_v9 = vld [vmem:[#allocation2 + $0x60] sm:$0x8]  ;;  %v2994_v29 = vld [vmem:[#allocation2 + $0x4] sm:$0xf]  ;;  %v3449_v30 = vld [vmem:[#allocation2 + $0x4] sm:$0x10] }
  0x9c   : > { %v3869_v61 = vpack.c.b16 %v412_v60, %v411_v59  ;;  %v661_v4 = vpack.c.b16 %v412_v60, %v412_v60  ;;  %v3037_v26 = vor.u32 %v3459_v24, %v3036_v22 }
  0x9d   : > { %v3856_v55 = vpack.c.b16 %v410_v53, %v409_v52  ;;  %v660_v3 = vpack.c.b16 %v410_v53, %v410_v53 }
  0x9e   : > { %v3010_v15 = vld [vmem:[#allocation2 + $0x34] sm:$0xf]  ;;  %v1202_v31 = vsel %vm778_vm1, %v3037_v26, 0 }
  0x9f   : > { %v3006_v11 = vld [vmem:[#allocation2 + $0x28] sm:$0xf]  ;;  %v3796_v18 = vor.u32 %v3453_v16, %v3010_v15  ;;  %v3840_v46 = vld [vmem:[#allocation2 + $0x34] sm:$0xf]  ;;  %1211 = vmatpush.bf16.msra.mxu2 %v1202_v31 }
  0xa0   : > { %v3786_v12 = vor.u32 %v3452_v10, %v3006_v11  ;;  %v3828_v36 = vld [vmem:[#allocation2 + $0x28] sm:$0xf]  ;;  %v3026_v41 = vld [vmem:[#allocation2 + $0x64] sm:$0xf]  ;;  %v408_v48 = vunpack.c.l.b16 %v3840_v46  ;;  %v425_v11 = vunpack.c.l.b16 %v379_v9 }
  0xa1   : > { %v3022_v19 = vld [vmem:[#allocation2 + $0x58] sm:$0xf]  ;;  %v406_v38 = vunpack.c.l.b16 %v3828_v36  ;;  %v3027_v43 = vor.u32 %v3457_v42, %v3026_v41  ;;  %v380_v10 = vld [vmem:[#allocation2 + $0x64] sm:$0xf] }
  0xa2   : > { %960 = vrot.lane.b32.xlu1 %v3786_v12, %s3623_s25  ;;  %941 = vrot.lane.b32.xlu0 %v3786_v12, %s3624_s26  ;;  %v3804_v21 = vor.u32 %v3456_v20, %v3022_v19  ;;  %v3846_v49 = vpack.c.b16 %v408_v48, %v407_v47  ;;  %v659_v54 = vpack.c.b16 %v408_v48, %v408_v48  ;;  %v3877_v0 = vld [vmem:[#allocation2 + $0x58] sm:$0xf]  ;;  %v426_v13 = vunpack.c.l.b16 %v380_v10  ;;  %v381_v19 = vld [vmem:[#allocation2 + $0x6c] sm:$0x8]  ;;  %v382_v20 = vld [vmem:[#allocation2 + $0x70] sm:$0xf] }
  0xa3   : > { %939 = vrot.lane.b32.xlu2 %v3774_v5, %s3624_s26  ;;  %v3833_v40 = vpack.c.b16 %v406_v38, %v405_v37  ;;  %v658_v56 = vpack.c.b16 %v406_v38, %v406_v38  ;;  %v414_v2 = vunpack.c.l.b16 %v3877_v0  ;;  %v446_v27 = vunpack.c.l.b16 %v381_v19 }
  0xa4   : > { %v427_v16 = vpack.c.b16 %v426_v13, %v425_v11  ;;  %v447_v28 = vunpack.c.l.b16 %v382_v20  ;;  %v2995_v37 = vor.u32 %v3449_v30, %v2994_v29  ;;  %v663_v48 = vpack.c.b16 %v426_v13, %v426_v13 }
  0xa5   : > { %v3882_v6 = vpack.c.b16 %v414_v2, %v413_v1  ;;  %v662_v15 = vpack.c.b16 %v414_v2, %v414_v2 }
  0xa6   : > { %v448_v38 = vpack.c.b16 %v447_v28, %v446_v27  ;;  %v680_v45 = vpack.c.b16 %v447_v28, %v447_v28 }
  0xaa   : > { %943 = vrot.lane.b32.xlu1 %v3796_v18, %s3624_s26  ;;  %945 = vrot.lane.b32.xlu0 %v3794_v17, %s3624_s26 }
  0xab   : > { %964 = vrot.lane.b32.xlu2 %v3794_v17, %s3623_s25 }
  0xb2   : > { %962 = vrot.lane.b32.xlu1 %v3796_v18, %s3623_s25  ;;  %949 = vrot.lane.b32.xlu0 %v3804_v21, %s3624_s26 }
  0xb3   : > { %968 = vrot.lane.b32.xlu2 %v3804_v21, %s3623_s25 }
  0xba   : > { %947 = vrot.lane.b32.xlu1 %v3818_v32, %s3624_s26  ;;  %430 = vrot.lane.b32.xlu0 %v3820_v33, %s3624_s26 }
  0xbb   : > { %428 = vrot.lane.b32.xlu2 %v3822_v34, %s3624_s26 }
  0xc2   : > { %966 = vrot.lane.b32.xlu1 %v3818_v32, %s3623_s25  ;;  %666 = vrot.lane.b32.xlu0 %v657_v39, %s3624_s26 }
  0xc3   : > { %451 = vrot.lane.b32.xlu2 %v3833_v40, %s3623_s25 }
  0xca   : > { %951 = vrot.lane.b32.xlu1 %v3027_v43, %s3624_s26  ;;  %681 = vrot.lane.b32.xlu0 %v657_v39, %s3623_s25 }
  0xcb   : > { %664 = vrot.lane.b32.xlu2 %v656_v44, %s3624_s26 }
  0xd2   : > { %970 = vrot.lane.b32.xlu1 %v3027_v43, %s3623_s25  ;;  %434 = vrot.lane.b32.xlu0 %v3846_v49, %s3624_s26 }
  0xd3   : > { %432 = vrot.lane.b32.xlu2 %v3833_v40, %s3624_s26 }
  0xda   : > { %449 = vrot.lane.b32.xlu1 %v3820_v33, %s3623_s25  ;;  %670 = vrot.lane.b32.xlu0 %v659_v54, %s3624_s26 }
  0xdb   : > { %455 = vrot.lane.b32.xlu2 %v3856_v55, %s3623_s25 }
  0xe2   : > { %683 = vrot.lane.b32.xlu1 %v658_v56, %s3623_s25  ;;  %685 = vrot.lane.b32.xlu0 %v659_v54, %s3623_s25 }
  0xe3   : > { %668 = vrot.lane.b32.xlu2 %v658_v56, %s3624_s26 }
  0xea   : > { %453 = vrot.lane.b32.xlu1 %v3846_v49, %s3623_s25  ;;  %438 = vrot.lane.b32.xlu0 %v3869_v61, %s3624_s26 }
  0xeb   : > { %436 = vrot.lane.b32.xlu2 %v3856_v55, %s3624_s26 }
  0xf2   : > { %687 = vrot.lane.b32.xlu1 %v660_v3, %s3623_s25  ;;  %674 = vrot.lane.b32.xlu0 %v661_v4, %s3624_s26 }
  0xf3   : > { %459 = vrot.lane.b32.xlu2 %v3882_v6, %s3623_s25 }
  0xf4   : > { %v938_v8 = vpop.permute.xlu2 %937 }
  0xf5   : > { %v976_v39 = vsel %vm465_vm2, %v2995_v37, %v938_v8 }
  0xfa   : > { %457 = vrot.lane.b32.xlu1 %v3869_v61, %s3623_s25  ;;  %689 = vrot.lane.b32.xlu0 %v661_v4, %s3623_s25 }
  0xfb   : > { %672 = vrot.lane.b32.xlu2 %v660_v3, %s3624_s26 }
  0xfd   : > { %v940_v14 = vpop.permute.xlu2 %939 }
  0xfe   : > { %v979_v53 = vsel %vm465_vm2, %v3777_v7, %v940_v14 }
 0x102   : > { %691 = vrot.lane.b32.xlu1 %v662_v15, %s3623_s25  ;;  %442 = vrot.lane.b32.xlu0 %v427_v16, %s3624_s26 }
 0x103   : > { %440 = vrot.lane.b32.xlu2 %v3882_v6, %s3624_s26 }
 0x105   : > { %v965_v35 = vpop.permute.xlu2 %964 }
 0x10a   : > { %461 = vrot.lane.b32.xlu1 %v427_v16, %s3623_s25  ;;  %676 = vrot.lane.b32.xlu0 %v662_v15, %s3624_s26 }
 0x10b   : > { %463 = vrot.lane.b32.xlu2 %v448_v38, %s3623_s25  ;;  %v959_v41 = vpop.permute.xlu0 %958 }
 0x10c   : > { %v999_v42 = vsel %vm490_vm3, %v976_v39, %v959_v41 }
 0x10d   : > { %v1022_v43 = vunpack.c.l.b16 %v999_v42  ;;  %v3908_v44 = vpop.permute.xlu2 %968  ;;  %v1023_v54 = vunpack.c.h.b16 %v999_v42 }
 0x10f   : > { %v1038_v47 = vpack.c.b16 %v1022_v43, %v1022_v43  ;;  %v1039_v4 = vpack.c.b16 %v1023_v54, %v1023_v54 }
 0x111   : > { %v1058_v50 = vshrl.u32 %v1038_v47, 16  ;;  %v1061_v52 = vshll.u32 %v1038_v47, 16  ;;  %v1067_v7 = vshll.u32 %v1039_v4, 16 }
 0x112   : > { %678 = vrot.lane.b32.xlu1 %v663_v48, %s3624_s26  ;;  %695 = vrot.lane.b32.xlu0 %v680_v45, %s3623_s25 }
 0x113   : > { %693 = vrot.lane.b32.xlu2 %v663_v48, %s3623_s25  ;;  %v1060_v63 = vrot.slane %v1058_v50, 4  ;;  %v1063_v1 = vrot.slane %v1061_v52, 5  ;;  %v1069_v31 = vrot.slane %v1067_v7, 5 }
 0x114   : > { %v961_v56 = vpop.permute.xlu1 %960  ;;  %v942_v57 = vpop.permute.xlu0 %941 }
 0x115   : > { %v1001_v59 = vsel %vm490_vm3, %v979_v53, %v961_v56  ;;  %v3916_v60 = vpop.permute.xlu2 %428  ;;  %v1064_v10 = vor.u32 %v1063_v1, %v1060_v63 }
 0x116   : > { %v1024_v2 = vunpack.c.l.b16 %v1001_v59  ;;  %v1025_v3 = vunpack.c.h.b16 %v1001_v59 }
 0x117   : > { %v1065_v26 = vrot.slane %v1064_v10, 4 }
 0x118   : > { %v1040_v8 = vpack.c.b16 %v1024_v2, %v1024_v2  ;;  %v1041_v9 = vpack.c.b16 %v1025_v3, %v1025_v3 }
 0x119   : > { %v1070_v41 = vsel %vm3925_vm6, %v1065_v26, %v1069_v31 }
 0x11a   : > { %v1072_v11 = vshrl.u32 %v1040_v8, 16  ;;  %v1075_v13 = vshll.u32 %v1040_v8, 16  ;;  %v1081_v16 = vshll.u32 %v1041_v9, 16  ;;  %v1172_v59 = vunpack.c.l.b16 %v1070_v41 }
 0x11c   : > { %v1074_v14 = vrot.slane %v1072_v11, 4  ;;  %v1077_v15 = vrot.slane %v1075_v13, 5  ;;  %v944_v19 = vpop.permute.xlu1 %943  ;;  %v3918_v20 = vpop.permute.xlu0 %945  ;;  %v1083_v38 = vrot.slane %v1081_v16, 5 }
 0x11d   : > { %v985_v22 = vsel %vm465_vm2, %v3786_v12, %v944_v19  ;;  %v3922_v24 = vpop.permute.xlu2 %451 }
 0x11e   : > { %v1078_v27 = vor.u32 %v1077_v15, %v1074_v14  ;;  %v1005_v28 = vsel %vm490_vm3, %v985_v22, %v965_v35  ;;  %v982_v35 = vsel %vm465_vm2, %v3774_v5, %v942_v57 }
 0x11f   : > { %v1028_v29 = vunpack.c.l.b16 %v1005_v28  ;;  %v1029_v42 = vunpack.c.h.b16 %v1005_v28 }
 0x120   : > { %v1079_v37 = vrot.slane %v1078_v27, 4 }
 0x121   : > { %v1044_v39 = vpack.c.b16 %v1028_v29, %v1028_v29  ;;  %v1045_v2 = vpack.c.b16 %v1029_v42, %v1029_v42 }
 0x122   : > { %v1084_v12 = vsel %vm3925_vm6, %v1079_v37, %v1083_v38 }
 0x123   : > { %v1100_v43 = vshrl.u32 %v1044_v39, 16  ;;  %v1103_v45 = vshll.u32 %v1044_v39, 16  ;;  %v1173_v47 = vunpack.c.l.b16 %v1084_v12  ;;  %v1109_v10 = vshll.u32 %v1045_v2, 16 }
 0x124   : > { %v963_v48 = vpop.permute.xlu1 %962  ;;  %v3935_v50 = vpop.permute.xlu0 %949 }
 0x125   : > { %v1102_v52 = vrot.slane %v1100_v43, 4  ;;  %v1105_v53 = vrot.slane %v1103_v45, 5  ;;  %v1003_v54 = vsel %vm490_vm3, %v982_v35, %v963_v48  ;;  %v3938_v56 = vpop.permute.xlu2 %664  ;;  %v1180_v3 = vpack.c.b16 %v1173_v47, %v1172_v59 }
 0x126   : > { %v1026_v63 = vunpack.c.l.b16 %v1003_v54  ;;  %v1027_v1 = vunpack.c.h.b16 %v1003_v54  ;;  %v1111_v27 = vrot.slane %v1109_v10, 5  ;;  %v988_v35 = vsel %vm465_vm2, %v3796_v18, %v3918_v20  ;;  %v2986_v10 = vld [vmem:[%s4691_s1] sm:$0xf] }
 0x127   : > { %v1106_v9 = vor.u32 %v1105_v53, %v1102_v52  ;;  %3038 = vmatmul.msk.bf16.vlgmr.msra.gmra.mxu2 %vm765_vm7, %v1180_v3  ;;  %v2978_v53 = vld [vmem:[%s4691_s1 + $0x8] sm:$0xf] }
 0x128   : > { %v1042_v4 = vpack.c.b16 %v1026_v63, %v1026_v63  ;;  %v1043_v8 = vpack.c.b16 %v1027_v1, %v1027_v1  ;;  %v3448_v1 = vld [vmem:[%s4691_s1 + $0x8] sm:$0x30] }
 0x129   : > { %v1107_v16 = vrot.slane %v1106_v9, 4 }
 0x12a   : > { %v1086_v5 = vshrl.u32 %v1042_v4, 16  ;;  %v1089_v57 = vshll.u32 %v1042_v4, 16  ;;  %v1095_v7 = vshll.u32 %v1043_v8, 16  ;;  %v2979_v4 = vor.u32 %v3448_v1, %v2978_v53 }
 0x12b   : > { %v1112_v39 = vsel %vm3925_vm6, %v1107_v16, %v1111_v27 }
 0x12c   : > { %v1088_v11 = vrot.slane %v1086_v5, 4  ;;  %v1091_v13 = vrot.slane %v1089_v57, 5  ;;  %v948_v14 = vpop.permute.xlu1 %947  ;;  %v431_v15 = vpop.permute.xlu0 %430  ;;  %v1097_v37 = vrot.slane %v1095_v7, 5  ;;  %v1175_v47 = vunpack.c.l.b16 %v1112_v39 }
 0x12d   : > { %v991_v19 = vsel %vm465_vm2, %v3794_v17, %v948_v14  ;;  %v3945_v29 = vpop.permute.xlu2 %432  ;;  %v471_v18 = vsel %vm465_vm2, %v3822_v34, %v431_v15  ;;  %v780_v57 = vsel %vm778_vm1, %v2979_v4, 0 }
 0x12e   : > { %v1092_v22 = vor.u32 %v1091_v13, %v1088_v11  ;;  %v1009_v26 = vsel %vm490_vm3, %v991_v19, %v3908_v44  ;;  %v3447_v11 = vld [vmem:[%s4691_s1] sm:$0x30]  ;;  %789 = vmatpush.bf16.msra.mxu0 %v780_v57  ;;  %v494_v16 = vsel %vm490_vm3, %v471_v18, %v3922_v24 }
 0x12f   : > { %v1032_v28 = vunpack.c.l.b16 %v1009_v26  ;;  %v1033_v41 = vunpack.c.h.b16 %v1009_v26  ;;  %v2987_v7 = vor.u32 %v3447_v11, %v2986_v10  ;;  %v517_v10 = vunpack.c.l.b16 %v494_v16 }
 0x130   : > { %v1093_v31 = vrot.slane %v1092_v22, 4 }
 0x131   : > { %v1048_v38 = vpack.c.b16 %v1032_v28, %v1032_v28  ;;  %v1049_v54 = vpack.c.b16 %v1033_v41, %v1033_v41  ;;  %v841_v26 = vsel %vm778_vm1, %v2987_v7, 0 }
 0x132   : > { %v1098_v12 = vsel %vm3925_vm6, %v1093_v31, %v1097_v37  ;;  %850 = vmatpush.bf16.msra.mxu1 %v841_v26  ;;  %v533_v26 = vpack.c.b16 %v517_v10, %v517_v10 }
 0x133   : > { %v1128_v42 = vshrl.u32 %v1048_v38, 16  ;;  %v1131_v17 = vshll.u32 %v1048_v38, 16  ;;  %v1174_v44 = vunpack.c.l.b16 %v1098_v12  ;;  %v1137_v13 = vshll.u32 %v1049_v54, 16 }
 0x134   : > { %v967_v43 = vpop.permute.xlu1 %966  ;;  %v3951_v45 = vpop.permute.xlu0 %666 }
 0x135   : > { %v1130_v48 = vrot.slane %v1128_v42, 4  ;;  %v1133_v52 = vrot.slane %v1131_v17, 5  ;;  %v1007_v59 = vsel %vm490_vm3, %v988_v35, %v967_v43  ;;  %v1181_v63 = vpack.c.b16 %v1175_v47, %v1174_v44  ;;  %v3965_v5 = vpop.permute.xlu2 %455 }
 0x136   : > { %v1030_v2 = vunpack.c.l.b16 %v1007_v59  ;;  %v1031_v3 = vunpack.c.h.b16 %v1007_v59  ;;  %v1139_v38 = vrot.slane %v1137_v13, 5  ;;  %v518_v42 = vunpack.c.h.b16 %v494_v16 }
 0x137   : > { %v1134_v8 = vor.u32 %v1133_v52, %v1130_v48  ;;  %3039 = vmatmul.msk.bf16.gmra.mxu2 %vm765_vm7, %v1181_v63 }
 0x138   : > { %v1046_v20 = vpack.c.b16 %v1030_v2, %v1030_v2  ;;  %v1047_v9 = vpack.c.b16 %v1031_v3, %v1031_v3  ;;  %v534_v53 = vpack.c.b16 %v518_v42, %v518_v42  ;;  %v2964_v2 = vld [vmem:[#allocation2] sm:$0x8]  ;;  %v3446_v3 = vld [vmem:[#allocation2] sm:$0xf0] }
 0x139   : > { %v1135_v15 = vrot.slane %v1134_v8, 4  ;;  %v2965_v7 = vor.u32 %v3446_v3, %v2964_v2 }
 0x13a   : > { %v1114_v34 = vshrl.u32 %v1046_v20, 16  ;;  %v1117_v14 = vshll.u32 %v1046_v20, 16  ;;  %v1123_v31 = vshll.u32 %v1047_v9, 16 }
 0x13b   : > { %v1140_v24 = vsel %vm3925_vm6, %v1135_v15, %v1139_v38 }
 0x13c   : > { %v952_v19 = vpop.permute.xlu1 %951  ;;  %v3977_v22 = vpop.permute.xlu0 %681  ;;  %v1116_v27 = vrot.slane %v1114_v34, 4  ;;  %v1119_v28 = vrot.slane %v1117_v14, 5  ;;  %v1125_v43 = vrot.slane %v1123_v31, 5  ;;  %v1177_v1 = vunpack.c.l.b16 %v1140_v24 }
 0x13d   : > { %v997_v37 = vsel %vm465_vm2, %v3804_v21, %v952_v19  ;;  %v3986_v52 = vpop.permute.xlu2 %668  ;;  %v468_v31 = vsel %vm465_vm2, %v2965_v7, %v3916_v60  ;;  %v364_v60 = vld [vmem:[#allocation2 + $0x4] sm:$0xf] }
 0x13e   : > { %v1013_v39 = vsel %vm490_vm3, %v997_v37, %v3875_v62  ;;  %v1120_v41 = vor.u32 %v1119_v28, %v1116_v27  ;;  %v994_v62 = vsel %vm465_vm2, %v3818_v32, %v3935_v50  ;;  %v569_v50 = vshrl.u32 %v534_v53, 16 }
 0x13f   : > { %v1036_v12 = vunpack.c.l.b16 %v1013_v39  ;;  %v1037_v44 = vunpack.c.h.b16 %v1013_v39  ;;  %v699_v3 = vsel %vm465_vm2, %v364_v60, %v3938_v56  ;;  %v702_v56 = vsel %vm465_vm2, %v3812_v25, %v3951_v45 }
 0x140   : > { %v1121_v17 = vrot.slane %v1120_v41, 4 }
 0x141   : > { %v1052_v47 = vpack.c.b16 %v1036_v12, %v1036_v12  ;;  %v1053_v4 = vpack.c.b16 %v1037_v44, %v1037_v44  ;;  %v571_v12 = vrot.slane %v569_v50, 7 }
 0x142   : > { %v1126_v21 = vsel %vm3925_vm6, %v1121_v17, %v1125_v43 }
 0x143   : > { %v1156_v35 = vshrl.u32 %v1052_v47, 16  ;;  %v1159_v48 = vshll.u32 %v1052_v47, 16  ;;  %v1176_v63 = vunpack.c.l.b16 %v1126_v21  ;;  %v1165_v14 = vshll.u32 %v1053_v4, 16 }
 0x144   : > { %v971_v54 = vpop.permute.xlu1 %970  ;;  %v435_v59 = vpop.permute.xlu0 %434 }
 0x145   : > { %v1158_v8 = vrot.slane %v1156_v35, 4  ;;  %v1161_v18 = vrot.slane %v1159_v48, 5  ;;  %v1011_v20 = vsel %vm490_vm3, %v994_v62, %v971_v54  ;;  %v1182_v13 = vpack.c.b16 %v1177_v1, %v1176_v63  ;;  %v4001_v24 = vpop.permute.xlu2 %436 }
 0x146   : > { %v1034_v9 = vunpack.c.l.b16 %v1011_v20  ;;  %v1035_v57 = vunpack.c.h.b16 %v1011_v20  ;;  %v477_v28 = vsel %vm465_vm2, %v3833_v40, %v435_v59  ;;  %v1167_v42 = vrot.slane %v1165_v14, 5 }
 0x147   : > { %v1162_v11 = vor.u32 %v1161_v18, %v1158_v8  ;;  %3040 = vmatmul.msk.bf16.gmra.mxu2 %vm765_vm7, %v1182_v13  ;;  %v498_v40 = vsel %vm490_vm3, %v477_v28, %v3965_v5  ;;  %v564_v35 = vshrl.u32 %v533_v26, 16  ;;  %v572_v48 = vshll.u32 %v534_v53, 16 }
 0x148   : > { %v1050_v34 = vpack.c.b16 %v1034_v9, %v1034_v9  ;;  %v1051_v32 = vpack.c.b16 %v1035_v57, %v1035_v57  ;;  %v522_v2 = vunpack.c.h.b16 %v498_v40  ;;  %v722_v20 = vsel %vm490_vm3, %v699_v3, %v3977_v22 }
 0x149   : > { %v1163_v27 = vrot.slane %v1162_v11, 4  ;;  %v574_v1 = vor.u32 %v572_v48, %v571_v12  ;;  %v2967_v18 = vrot.slane %v564_v35, 11  ;;  %v474_v12 = vsel %vm465_vm2, %v3820_v33, %v3945_v29 }
 0x14a   : > { %v1142_v15 = vshrl.u32 %v1050_v34, 16  ;;  %v1145_v19 = vshll.u32 %v1050_v34, 16  ;;  %v1151_v38 = vshll.u32 %v1051_v32, 16  ;;  %v538_v34 = vpack.c.b16 %v522_v2, %v522_v2 }
 0x14b   : > { %v1168_v21 = vsel %vm3925_vm6, %v1163_v27, %v1167_v42  ;;  %v575_v14 = vsel %vm4013_vm10, %v2967_v18, %v574_v1  ;;  %v521_v27 = vunpack.c.l.b16 %v498_v40 }
 0x14c   : > { %v1144_v16 = vrot.slane %v1142_v15, 4  ;;  %v1147_v37 = vrot.slane %v1145_v19, 5  ;;  %v450_v39 = vpop.permute.xlu1 %449  ;;  %v3999_v41 = vpop.permute.xlu0 %670  ;;  %v1153_v54 = vrot.slane %v1151_v38, 5  ;;  %v1179_v57 = vunpack.c.l.b16 %v1168_v21 }
 0x14d   : > { %v492_v17 = vsel %vm490_vm3, %v468_v31, %v450_v39  ;;  %v748_v15 = vunpack.c.l.b16 %v722_v20  ;;  %v460_v28 = vpop.permute.xlu2 %459  ;;  %v595_v45 = vshrl.u32 %v538_v34, 16  ;;  %v537_v38 = vpack.c.b16 %v521_v27, %v521_v27 }
 0x14e   : > { %v1148_v43 = vor.u32 %v1147_v37, %v1144_v16  ;;  %v515_v44 = vunpack.c.l.b16 %v492_v17  ;;  %v516_v47 = vunpack.c.h.b16 %v492_v17  ;;  %v812_v37 = vunpack.c.l.b16 %v575_v14 }
 0x14f   : > { %v590_v48 = vshrl.u32 %v537_v38, 16  ;;  %v598_v21 = vshll.u32 %v538_v34, 16 }
 0x150   : > { %v1149_v62 = vrot.slane %v1148_v43, 4  ;;  %v531_v59 = vpack.c.b16 %v515_v44, %v515_v44  ;;  %v532_v63 = vpack.c.b16 %v516_v47, %v516_v47  ;;  %v597_v43 = vrot.slane %v595_v45, 7 }
 0x152   : > { %v551_v4 = vshrl.u32 %v531_v59, 16  ;;  %v556_v5 = vshrl.u32 %v532_v63, 16  ;;  %v1154_v8 = vsel %vm3925_vm6, %v1149_v62, %v1153_v54  ;;  %v559_v11 = vshll.u32 %v532_v63, 16 }
 0x153   : > { %v1178_v9 = vunpack.c.l.b16 %v1154_v8  ;;  %v600_v59 = vor.u32 %v598_v21, %v597_v43  ;;  %v705_v63 = vsel %vm465_vm2, %v3806_v23, %v3986_v52 }
 0x154   : > { %v558_v10 = vrot.slane %v556_v5, 7  ;;  %v684_v13 = vpop.permute.xlu1 %683  ;;  %v686_v7 = vpop.permute.xlu0 %685  ;;  %v2966_v19 = vrot.slane %v551_v4, 11  ;;  %v708_v4 = vsel %vm465_vm2, %v3828_v36, %v3999_v41 }
 0x155   : > { %v724_v32 = vsel %vm490_vm3, %v702_v56, %v684_v13  ;;  %v1183_v50 = vpack.c.b16 %v1179_v57, %v1178_v9  ;;  %v673_v33 = vpop.permute.xlu2 %672  ;;  %v726_v3 = vsel %vm490_vm3, %v705_v63, %v686_v7 }
 0x156   : > { %v561_v22 = vor.u32 %v559_v11, %v558_v10  ;;  %v749_v26 = vunpack.c.l.b16 %v724_v32  ;;  %v750_v23 = vunpack.c.l.b16 %v726_v3 }
 0x157   : > { %3041 = vmatmul.msk.bf16.gmra.mxu2 %vm765_vm7, %v1183_v50 }
 0x158   : > { %v756_v31 = vpack.c.b16 %v749_v26, %v748_v15  ;;  %v562_v25 = vsel %vm4013_vm10, %v2966_v19, %v561_v22  ;;  %v480_v19 = vsel %vm465_vm2, %v3846_v49, %v4001_v24 }
 0x159   : > { %v811_v16 = vunpack.c.l.b16 %v562_v25 }
 0x15a   : > { %2980 = vmatmul.msk.bf16.vlgmr.msra.gmra.mxu0 %vm765_vm7, %v756_v31 }
 0x15b   : > { %v819_v39 = vpack.c.b16 %v812_v37, %v811_v16 }
 0x15c   : > { %v454_v42 = vpop.permute.xlu1 %453  ;;  %v439_v17 = vpop.permute.xlu0 %438 }
 0x15d   : > { %v496_v40 = vsel %vm490_vm3, %v474_v12, %v454_v42  ;;  %v483_v44 = vsel %vm465_vm2, %v3856_v55, %v439_v17  ;;  %2988 = vmatmul.msk.bf16.vlgmr.msra.gmra.mxu1 %vm765_vm7, %v819_v39  ;;  %v2969_v55 = vrot.slane %v590_v48, 11  ;;  %v441_v14 = vpop.permute.xlu2 %440  ;;  %v711_v39 = vsel %vm465_vm2, %v3840_v46, %v673_v33 }
 0x15e   : > { %v519_v47 = vunpack.c.l.b16 %v496_v40  ;;  %v520_v60 = vunpack.c.h.b16 %v496_v40  ;;  %v502_v35 = vsel %vm490_vm3, %v483_v44, %v460_v28 }
 0x15f   : > { %v526_v29 = vunpack.c.h.b16 %v502_v35  ;;  %v601_v56 = vsel %vm4013_vm10, %v2969_v55, %v600_v59  ;;  %v525_v13 = vunpack.c.l.b16 %v502_v35 }
 0x160   : > { %v535_v62 = vpack.c.b16 %v519_v47, %v519_v47  ;;  %v536_v54 = vpack.c.b16 %v520_v60, %v520_v60  ;;  %v814_v32 = vunpack.c.l.b16 %v601_v56 }
 0x161   : > { %v542_v9 = vpack.c.b16 %v526_v29, %v526_v29  ;;  %v541_v50 = vpack.c.b16 %v525_v13, %v525_v13 }
 0x162   : > { %v577_v1 = vshrl.u32 %v535_v62, 16  ;;  %v582_v2 = vshrl.u32 %v536_v54, 16  ;;  %v585_v8 = vshll.u32 %v536_v54, 16 }
 0x163   : > { %v621_v36 = vshrl.u32 %v542_v9, 16  ;;  %v616_v45 = vshrl.u32 %v541_v50, 16  ;;  %v624_v16 = vshll.u32 %v542_v9, 16 }
 0x164   : > { %v584_v5 = vrot.slane %v582_v2, 7  ;;  %v688_v18 = vpop.permute.xlu1 %687  ;;  %v675_v20 = vpop.permute.xlu0 %674  ;;  %v2968_v52 = vrot.slane %v577_v1, 11 }
 0x165   : > { %v728_v57 = vsel %vm490_vm3, %v708_v4, %v688_v18  ;;  %v623_v27 = vrot.slane %v621_v36, 7  ;;  %v2971_v24 = vrot.slane %v616_v45, 11  ;;  %v714_v43 = vsel %vm465_vm2, %v3851_v51, %v675_v20  ;;  %v464_v35 = vpop.permute.xlu2 %463 }
 0x166   : > { %v587_v10 = vor.u32 %v585_v8, %v584_v5  ;;  %v751_v11 = vunpack.c.l.b16 %v728_v57  ;;  %v486_v8 = vsel %vm465_vm2, %v3869_v61, %v441_v14 }
 0x167   : > { %v626_v12 = vor.u32 %v624_v16, %v623_v27 }
 0x168   : > { %v757_v7 = vpack.c.b16 %v751_v11, %v750_v23  ;;  %v588_v34 = vsel %vm4013_vm10, %v2968_v52, %v587_v10 }
 0x169   : > { %v813_v41 = vunpack.c.l.b16 %v588_v34  ;;  %v627_v62 = vsel %vm4013_vm10, %v2971_v24, %v626_v12  ;;  %v3489_v24 = vld [vmem:[%s4693_s3 + $0xe8] sm:$0xff] }
 0x16a   : > { %2981 = vmatmul.msk.bf16.gmra.mxu0 %vm765_vm7, %v757_v7  ;;  %v816_v4 = vunpack.c.l.b16 %v627_v62  ;;  %v3466_v62 = vld [vmem:[%s4693_s3 + $0x30] sm:$0xff] }
 0x16b   : > { %v820_v15 = vpack.c.b16 %v814_v32, %v813_v41 }
 0x16c   : > { %v458_v22 = vpop.permute.xlu1 %457  ;;  %v690_v26 = vpop.permute.xlu0 %689 }
 0x16d   : > { %v500_v28 = vsel %vm490_vm3, %v480_v19, %v458_v22  ;;  %2989 = vmatmul.msk.bf16.gmra.mxu1 %vm765_vm7, %v820_v15  ;;  %v730_v49 = vsel %vm490_vm3, %v711_v39, %v690_v26  ;;  %v694_v32 = vpop.permute.xlu2 %693 }
 0x16e   : > { %v523_v31 = vunpack.c.l.b16 %v500_v28  ;;  %v524_v25 = vunpack.c.h.b16 %v500_v28  ;;  %v752_v48 = vunpack.c.l.b16 %v730_v49  ;;  %v3499_v49 = vld [vmem:[%s4693_s3 + $0x138] sm:$0xff] }
 0x16f   : > { %1881 = vmatpush.bf16.msrb.mxu0 %v3499_v49 }
 0x170   : > { %v539_v37 = vpack.c.b16 %v523_v31, %v523_v31  ;;  %v540_v38 = vpack.c.b16 %v524_v25, %v524_v25 }
 0x172   : > { %v603_v42 = vshrl.u32 %v539_v37, 16  ;;  %v608_v17 = vshrl.u32 %v540_v38, 16  ;;  %v611_v44 = vshll.u32 %v540_v38, 16 }
 0x174   : > { %v610_v40 = vrot.slane %v608_v17, 7  ;;  %v692_v47 = vpop.permute.xlu1 %691  ;;  %v443_v60 = vpop.permute.xlu0 %442  ;;  %v2970_v54 = vrot.slane %v603_v42, 11  ;;  %v3490_v17 = vld [vmem:[%s4693_s3 + $0xf0] sm:$0xff] }
 0x175   : > { %v732_v21 = vsel %vm490_vm3, %v714_v43, %v692_v47  ;;  %v489_v46 = vsel %vm465_vm2, %v3882_v6, %v443_v60  ;;  %v3488_v43 = vld [vmem:[%s4693_s3 + $0xe0] sm:$0xff]  ;;  %v3497_v47 = vld [vmem:[%s4693_s3 + $0x128] sm:$0xff]  ;;  %v3507_v60 = vld [vmem:[%s4693_s3 + $0x178] sm:$0xff] }
 0x176   : > { %v613_v59 = vor.u32 %v611_v44, %v610_v40  ;;  %v753_v33 = vunpack.c.l.b16 %v732_v21  ;;  %v506_v29 = vsel %vm490_vm3, %v489_v46, %v464_v35  ;;  %v3498_v40 = vld [vmem:[%s4693_s3 + $0x130] sm:$0xff]  ;;  %v3487_v44 = vld [vmem:[%s4693_s3 + $0xd8] sm:$0xff]  ;;  %1910 = vmatpush.bf16.msrb.mxu1 %v3507_v60  ;;  %v3496_v21 = vld [vmem:[%s4693_s3 + $0x120] sm:$0xff] }
 0x177   : > { %v530_v51 = vunpack.c.h.b16 %v506_v29  ;;  %v529_v63 = vunpack.c.l.b16 %v506_v29  ;;  %1882 = vmatpush.bf16.msrb.mxu0 %v3498_v40  ;;  %v3467_v35 = vld [vmem:[%s4693_s3 + $0x38] sm:$0xff]  ;;  %v3506_v46 = vld [vmem:[%s4693_s3 + $0x170] sm:$0xff]  ;;  %v3472_v40 = vld [vmem:[%s4693_s3 + $0x60] sm:$0xff] }
 0x178   : > { %v758_v1 = vpack.c.b16 %v753_v33, %v752_v48  ;;  %v614_v2 = vsel %vm4013_vm10, %v2970_v54, %v613_v59  ;;  %2131 = vmatpush.bf16.msrb.mxu2 %v3467_v35  ;;  %v3486_v48 = vld [vmem:[%s4693_s3 + $0xd0] sm:$0xff]  ;;  %v3485_v54 = vld [vmem:[%s4693_s3 + $0xc8] sm:$0xff]  ;;  %v3495_v59 = vld [vmem:[%s4693_s3 + $0x118] sm:$0xff] }
 0x179   : > { %v546_v55 = vpack.c.b16 %v530_v51, %v530_v51  ;;  %v815_v3 = vunpack.c.l.b16 %v614_v2  ;;  %v545_v18 = vpack.c.b16 %v529_v63, %v529_v63  ;;  %v3505_v33 = vld [vmem:[%s4693_s3 + $0x168] sm:$0xff]  ;;  %v3484_v63 = vld [vmem:[%s4693_s3 + $0xc0] sm:$0xff] }
 0x17a   : > { %2982 = vmatmul.msk.bf16.gmra.mxu0 %vm765_vm7, %v758_v1  ;;  %1911 = vmatpush.bf16.msrb.mxu1 %v3506_v46  ;;  %v3465_v51 = vld [vmem:[%s4693_s3 + $0x28] sm:$0xff]  ;;  %v3494_v1 = vld [vmem:[%s4693_s3 + $0x110] sm:$0xff]  ;;  %v3504_v2 = vld [vmem:[%s4693_s3 + $0x160] sm:$0xff] }
 0x17b   : > { %v647_v6 = vshrl.u32 %v546_v55, 16  ;;  %v821_v5 = vpack.c.b16 %v816_v4, %v815_v3  ;;  %v642_v10 = vshrl.u32 %v545_v18, 16  ;;  %v650_v11 = vshll.u32 %v546_v55, 16  ;;  %1883 = vmatpush.bf16.msrb.mxu0 %v3497_v47  ;;  %v3464_v55 = vld [vmem:[%s4693_s3 + $0x20] sm:$0xff]  ;;  %v3493_v3 = vld [vmem:[%s4693_s3 + $0x108] sm:$0xff]  ;;  %v3503_v4 = vld [vmem:[%s4693_s3 + $0x158] sm:$0xff] }
 0x17c   : > { %v462_v20 = vpop.permute.xlu1 %461  ;;  %v677_v9 = vpop.permute.xlu0 %676  ;;  %2132 = vmatpush.bf16.msrb.mxu2 %v3466_v62  ;;  %v3492_v18 = vld [vmem:[%s4693_s3 + $0x100] sm:$0xff] }
 0x17d   : > { %v504_v57 = vsel %vm490_vm3, %v486_v8, %v462_v20  ;;  %2990 = vmatmul.msk.bf16.gmra.mxu1 %vm765_vm7, %v821_v5  ;;  %v649_v56 = vrot.slane %v647_v6, 7  ;;  %v717_v34 = vsel %vm465_vm2, %v3863_v58, %v677_v9  ;;  %v2973_v50 = vrot.slane %v642_v10, 11  ;;  %v3475_v6 = vld [vmem:[%s4693_s3 + $0x78] sm:$0xff]  ;;  %v3502_v20 = vld [vmem:[%s4693_s3 + $0x150] sm:$0xff]  ;;  %v3501_v10 = vld [vmem:[%s4693_s3 + $0x148] sm:$0xff] }
 0x17e   : > { %v527_v23 = vunpack.c.l.b16 %v504_v57  ;;  %v528_v52 = vunpack.c.h.b16 %v504_v57  ;;  %v734_v19 = vsel %vm490_vm3, %v717_v34, %v694_v32  ;;  %1912 = vmatpush.bf16.msrb.mxu1 %v3505_v33  ;;  %v3463_v5 = vld [vmem:[%s4693_s3 + $0x18] sm:$0xff] }
 0x17f   : > { %v652_v36 = vor.u32 %v650_v11, %v649_v56  ;;  %v754_v45 = vunpack.c.l.b16 %v734_v19  ;;  %1884 = vmatpush.bf16.msrb.mxu0 %v3496_v21  ;;  %v3462_v56 = vld [vmem:[%s4693_s3 + $0x10] sm:$0xff] }
 0x180   : > { %v543_v13 = vpack.c.b16 %v527_v23, %v527_v23  ;;  %v544_v7 = vpack.c.b16 %v528_v52, %v528_v52  ;;  %2133 = vmatpush.bf16.msrb.mxu2 %v3465_v51  ;;  %v4175_v52 = vld [vmem:[%s4692_s2] ss:$0 sm:$0xff] }
 0x181   : > { %v653_v58 = vsel %vm4013_vm10, %v2973_v50, %v652_v36 }
 0x182   : > { %v629_v41 = vshrl.u32 %v543_v13, 16  ;;  %v634_v61 = vshrl.u32 %v544_v7, 16  ;;  %v637_v15 = vshll.u32 %v544_v7, 16  ;;  %v818_v12 = vunpack.c.l.b16 %v653_v58  ;;  %1913 = vmatpush.bf16.msrb.mxu1 %v3504_v2  ;;  %v3474_v13 = vld [vmem:[%s4693_s3 + $0x70] sm:$0xff]  ;;  %v3461_v7 = vld [vmem:[%s4693_s3 + $0x8] sm:$0xff] }
 0x183   : > { %1885 = vmatpush.bf16.msrb.mxu0 %v3495_v59 }
 0x184   : > { %v636_v14 = vrot.slane %v634_v61, 7  ;;  %v679_v22 = vpop.permute.xlu1 %678  ;;  %v696_v26 = vpop.permute.xlu0 %695  ;;  %v2972_v28 = vrot.slane %v629_v41, 11  ;;  %2134 = vmatpush.bf16.msrb.mxu2 %v3464_v55  ;;  %v3500_v41 = vld [vmem:[%s4693_s3 + $0x140] sm:$0xff]  ;;  %v3471_v55 = vld [vmem:[%s4693_s3 + $0x58] sm:$0xff] }
 0x185   : > { %v720_v27 = vsel %vm465_vm2, %v3877_v0, %v679_v22  ;;  %v3491_v0 = vld [vmem:[%s4693_s3 + $0xf8] sm:$0xff] }
 0x186   : > { %v639_v31 = vor.u32 %v637_v15, %v636_v14  ;;  %v736_v25 = vsel %vm490_vm3, %v720_v27, %v696_v26  ;;  %1852 = vmatpush.bf16.msra.mxu3 %v3491_v0  ;;  %1914 = vmatpush.bf16.msrb.mxu1 %v3503_v4  ;;  %v3460_v14 = vld [vmem:[%s4693_s3] sm:$0xff]  ;;  %v3473_v26 = vld [vmem:[%s4693_s3 + $0x68] sm:$0xff] }
 0x187   : > { %v755_v16 = vunpack.c.l.b16 %v736_v25  ;;  %1886 = vmatpush.bf16.msrb.mxu0 %v3494_v1 }
 0x188   : > { %v640_v37 = vsel %vm4013_vm10, %v2972_v28, %v639_v31  ;;  %2135 = vmatpush.bf16.msrb.mxu2 %v3463_v5  ;;  %v1302_v31 = vld [vmem:[#allocation3 + $0x4] sm:$0xf] }
 0x189   : > { %v759_v38 = vpack.c.b16 %v755_v16, %v754_v45  ;;  %v817_v39 = vunpack.c.l.b16 %v640_v37  ;;  %v1301_v45 = vld [vmem:[#allocation3] sm:$0x8]  ;;  %v1303_v16 = vld [vmem:[#allocation3 + $0xc] sm:$0x8] }
 0x18a   : > { %1853 = vmatpush.bf16.msra.mxu3 %v3490_v17  ;;  %1915 = vmatpush.bf16.msrb.mxu1 %v3502_v20 }
 0x18b   : > { %2983 = vmatmul.msk.bf16.gmra.mxu0 %vm765_vm7, %v759_v38  ;;  %v822_v42 = vpack.c.b16 %v818_v12, %v817_v39  ;;  %v1338_v39 = vunpack.c.l.b16 %v1302_v31  ;;  %v1305_v12 = vld [vmem:[#allocation3 + $0x18] sm:$0x8] }
 0x18c   : > { %1887 = vmatpush.bf16.msrb.mxu0 %v3493_v3  ;;  %2136 = vmatpush.bf16.msrb.mxu2 %v3462_v56  ;;  %v3482_v31 = vld [vmem:[%s4693_s3 + $0xb0] sm:$0xff] }
 0x18d   : > { %2991 = vmatmul.msk.bf16.gmra.mxu1 %vm765_vm7, %v822_v42 }
 0x18e   : > { %1854 = vmatpush.bf16.msra.mxu3 %v3489_v24  ;;  %1916 = vmatpush.bf16.msrb.mxu1 %v3501_v10  ;;  %v1337_v24 = vunpack.c.l.b16 %v1301_v45 }
 0x190   : > { %1888 = vmatpush.bf16.msrb.mxu0 %v3492_v18  ;;  %2137 = vmatpush.bf16.msrb.mxu2 %v3461_v7 }
 0x192   : > { %1855 = vmatpush.bf16.msra.mxu3 %v3488_v43  ;;  %1917 = vmatpush.bf16.msrb.mxu1 %v3500_v41  ;;  %v1339_v43 = vunpack.c.l.b16 %v1303_v16  ;;  %v1309_v41 = vld [vmem:[#allocation3 + $0x30] sm:$0x8] }
 0x194   : > { %2138 = vmatpush.bf16.msrb.mxu2 %v3460_v14  ;;  %v1361_v46 = vpack.c.b16 %v1339_v43, %v1337_v24 }
 0x196   : > { %1856 = vmatpush.bf16.msra.mxu3 %v3487_v44  ;;  %v4200_v44 = vunpack.c.l.b16 %v1305_v12  ;;  %v1394_v2 = vshrl.u32 %v1361_v46, 16 }
 0x198   : > { %v3042_v56 = vrot.slane %v1394_v2, 11 }
 0x19a   : > { %1857 = vmatpush.bf16.msra.mxu3 %v3486_v48 }
 0x19e   : > { %1858 = vmatpush.bf16.msra.mxu3 %v3485_v54  ;;  %v1365_v54 = vpack.c.b16 %v4200_v44, %v1339_v43 }
 0x1a0   : > { %v1420_v4 = vshrl.u32 %v1365_v54, 16 }
 0x1a2   : > { %1859 = vmatpush.bf16.msra.mxu3 %v3484_v63 }
 0x1a6   : > { %2160 = vmatpush.bf16.msrb.mxu3 %v3475_v6 }
 0x1aa   : > { %v1213_v29 = vpop.f32.mrf.mxu2  ;;  %2161 = vmatpush.bf16.msrb.mxu3 %v3474_v13 }
 0x1ae   : > { %2162 = vmatpush.bf16.msrb.mxu3 %v3473_v26  ;;  %v3470_v26 = vld [vmem:[%s4693_s3 + $0x50] sm:$0xff] }
 0x1b2   : > { %v1215_v9 = vpop.f32.mrf.mxu2  ;;  %2163 = vmatpush.bf16.msrb.mxu3 %v3472_v40 }
 0x1b6   : > { %2164 = vmatpush.bf16.msrb.mxu3 %v3471_v55 }
 0x1ba   : > { %v1218_v32 = vpop.f32.mrf.mxu2  ;;  %2165 = vmatpush.bf16.msrb.mxu3 %v3470_v26 }
 0x1c2   : > { %v1220_v42 = vpop.f32.mrf.mxu2 }
 0x1ca   : > { %v1223_v3 = vpop.f32.mrf.mxu2 }
 0x1d7   : > { %v791_v8 = vpop.f32.mrf.mxu0 }
 0x1da   : > { %v852_v57 = vpop.f32.mrf.mxu1 }
 0x1db   : > { %v853_v23 = vadd.f32 %v852_v57, %v791_v8 }
 0x1dd   : > { %v1233_v11 = vadd.f32 %v1213_v29, %v853_v23  ;;  %v1307_v23 = vld [vmem:[#allocation3 + $0x24] sm:$0x8] }
 0x1df   : > { %v1245_v34 = vadd.f32 %v4175_v52, %v1233_v11  ;;  %v793_v36 = vpop.f32.mrf.mxu0  ;;  %v3044_v11 = vrot.slane %v1420_v4, 11 }
 0x1e1   : > { %v1253_v61 = vmax.f32 %v1245_v34, 0.0 }
 0x1e2   : > { %v854_v50 = vpop.f32.mrf.mxu1 }
 0x1e3   : > { %v1261_v15 = vpack.c.bf16 %v1253_v61, %v1253_v61  ;;  %v855_v19 = vadd.f32 %v854_v50, %v793_v36  ;;  %v3483_v61 = vld [vmem:[%s4693_s3 + $0xb8] sm:$0xff]  ;;  %v4214_v50 = vunpack.c.l.b16 %v1307_v23 }
 0x1e4   : > { %2189 = vmatpush.bf16.msra.mxu0 %v3483_v61  ;;  %v1313_v61 = vld [vmem:[#allocation3 + $0x48] sm:$0x8] }
 0x1e5   : > { %1293 = vst [vmem:[#allocation3 + $0x10] sm:$0xf] %v1261_v15  ;;  %v1234_v22 = vadd.f32 %v1215_v9, %v855_v19  ;;  %v1369_v12 = vpack.c.b16 %v4214_v50, %v4200_v44 }
 0x1e7   : > { %v1246_v27 = vadd.f32 %v4175_v52, %v1234_v22  ;;  %v796_v28 = vpop.f32.mrf.mxu0 }
 0x1e8   : > { %2190 = vmatpush.bf16.msra.mxu0 %v3482_v31  ;;  %v3478_v31 = vld [vmem:[%s4693_s3 + $0x90] sm:$0xff] }
 0x1e9   : > { %v1254_v25 = vmax.f32 %v1246_v27, 0.0  ;;  %v3523_v27 = vld [vmem:[%s4693_s3 + $0x1f8] sm:$0xff] }
 0x1ea   : > { %v857_v58 = vpop.f32.mrf.mxu1  ;;  %2804 = vmatpush.bf16.msra.mxu2 %v3523_v27 }
 0x1eb   : > { %v1262_v37 = vpack.c.bf16 %v1254_v25, %v1254_v25  ;;  %v858_v38 = vadd.f32 %v857_v58, %v796_v28  ;;  %v4228_v28 = vunpack.c.l.b16 %v1309_v41 }
 0x1ec   : > { %v1304_v0 = vld [vmem:[#allocation3 + $0x10] sm:$0xf] }
 0x1ed   : > { %1294 = vst [vmem:[#allocation3 + $0x1c] sm:$0xf] %v1262_v37  ;;  %v1235_v17 = vadd.f32 %v1218_v32, %v858_v38  ;;  %v1340_v49 = vunpack.c.l.b16 %v1304_v0  ;;  %v1225_v37 = vpop.f32.mrf.mxu2  ;;  %v1373_v40 = vpack.c.b16 %v4228_v28, %v4214_v50 }
 0x1ef   : > { %v1247_v47 = vadd.f32 %v4175_v52, %v1235_v17  ;;  %v798_v60 = vpop.f32.mrf.mxu0  ;;  %v1363_v35 = vpack.c.b16 %v1340_v49, %v1338_v39  ;;  %v3469_v17 = vld [vmem:[%s4693_s3 + $0x48] sm:$0xff] }
 0x1f0   : > { %2166 = vmatpush.bf16.msrb.mxu3 %v3469_v17 }
 0x1f1   : > { %v1255_v48 = vmax.f32 %v1247_v47, 0.0  ;;  %v1399_v21 = vshrl.u32 %v1363_v35, 16  ;;  %1860 = vmatmul.bf16.vlgmr.msra.gmra.mxu3 %v1363_v35  ;;  %v1402_v6 = vshll.u32 %v1363_v35, 16  ;;  %v3481_v47 = vld [vmem:[%s4693_s3 + $0xa8] sm:$0xff] }
 0x1f2   : > { %v859_v62 = vpop.f32.mrf.mxu1  ;;  %2191 = vmatpush.bf16.msra.mxu0 %v3481_v47 }
 0x1f3   : > { %v1263_v59 = vpack.c.bf16 %v1255_v48, %v1255_v48  ;;  %v860_v33 = vadd.f32 %v859_v62, %v798_v60  ;;  %v1401_v51 = vrot.slane %v1399_v21, 7  ;;  %v1446_v21 = vshrl.u32 %v1369_v12, 16  ;;  %v3514_v62 = vld [vmem:[%s4693_s3 + $0x1b0] sm:$0xff] }
 0x1f4   : > { %v1306_v29 = vld [vmem:[#allocation3 + $0x1c] sm:$0xf] }
 0x1f5   : > { %1295 = vst [vmem:[#allocation3 + $0x28] sm:$0xf] %v1263_v59  ;;  %v1236_v63 = vadd.f32 %v1220_v42, %v860_v33  ;;  %v4204_v1 = vunpack.c.l.b16 %v1306_v29  ;;  %v1404_v20 = vor.u32 %v1402_v6, %v1401_v51  ;;  %v3522_v33 = vld [vmem:[%s4693_s3 + $0x1f0] sm:$0xff]  ;;  %v1472_v51 = vshrl.u32 %v1373_v40, 16 }
 0x1f6   : > { %2805 = vmatpush.bf16.msra.mxu2 %v3522_v33  ;;  %v3046_v4 = vrot.slane %v1446_v21, 11  ;;  %v3519_v33 = vld [vmem:[%s4693_s3 + $0x1d8] sm:$0xff] }
 0x1f7   : > { %v1248_v5 = vadd.f32 %v4175_v52, %v1236_v63  ;;  %v801_v8 = vpop.f32.mrf.mxu0  ;;  %v1367_v18 = vpack.c.b16 %v4204_v1, %v1340_v49  ;;  %v4220_v22 = vsel %vm4013_vm10, %v3042_v56, %v1404_v20  ;;  %v3515_v49 = vld [vmem:[%s4693_s3 + $0x1b8] sm:$0xff]  ;;  %v3480_v63 = vld [vmem:[%s4693_s3 + $0xa0] sm:$0xff] }
 0x1f8   : > { %v1939_v38 = vunpack.c.l.b16 %v4220_v22  ;;  %2775 = vmatpush.bf16.msra.mxu1 %v3515_v49  ;;  %2192 = vmatpush.bf16.msra.mxu0 %v3480_v63  ;;  %v3520_v49 = vld [vmem:[%s4693_s3 + $0x1e0] sm:$0xff] }
 0x1f9   : > { %v1256_v9 = vmax.f32 %v1248_v5, 0.0  ;;  %v1425_v57 = vshrl.u32 %v1367_v18, 16  ;;  %1889 = vmatmul.bf16.vlgmr.msrb.gmra.mxu0 %v1367_v18  ;;  %v1428_v34 = vshll.u32 %v1367_v18, 16  ;;  %v1228_v18 = vpop.f32.mrf.mxu2 }
 0x1fa   : > { %v862_v10 = vpop.f32.mrf.mxu1 }
 0x1fb   : > { %v1264_v13 = vpack.c.bf16 %v1256_v9, %v1256_v9  ;;  %v1427_v7 = vrot.slane %v1425_v57, 7  ;;  %v863_v36 = vadd.f32 %v862_v10, %v801_v8  ;;  %v3048_v9 = vrot.slane %v1472_v51, 11  ;;  %v1311_v57 = vld [vmem:[#allocation3 + $0x3c] sm:$0x8] }
 0x1fc   : > { %v1308_v32 = vld [vmem:[#allocation3 + $0x28] sm:$0xf]  ;;  %2776 = vmatpush.bf16.msra.mxu1 %v3514_v62  ;;  %v4287_v27 = vunpack.c.l.b16 %v1311_v57  ;;  %v2220_v57 = vld [vmem:[#allocation3 + $0x10] sm:$0xf] }
 0x1fd   : > { %1296 = vst [vmem:[#allocation3 + $0x34] sm:$0xf] %v1264_v13  ;;  %v1430_v14 = vor.u32 %v1428_v34, %v1427_v7  ;;  %v1237_v15 = vadd.f32 %v1223_v3, %v863_v36  ;;  %v4216_v19 = vunpack.c.l.b16 %v1308_v32  ;;  %v3468_v13 = vld [vmem:[%s4693_s3 + $0x40] sm:$0xff]  ;;  %v3479_v7 = vld [vmem:[%s4693_s3 + $0x98] sm:$0xff]  ;;  %v3513_v34 = vld [vmem:[%s4693_s3 + $0x1a8] sm:$0xff] }
 0x1fe   : > { %v3521_v32 = vld [vmem:[%s4693_s3 + $0x1e8] sm:$0xff]  ;;  %2167 = vmatpush.bf16.msrb.mxu3 %v3468_v13  ;;  %2193 = vmatpush.bf16.msra.mxu0 %v3479_v7 }
 0x1ff   : > { %v1249_v25 = vadd.f32 %v4175_v52, %v1237_v15  ;;  %v803_v58 = vpop.f32.mrf.mxu0  ;;  %v1371_v45 = vpack.c.b16 %v4216_v19, %v4204_v1  ;;  %v4238_v16 = vsel %vm4013_vm10, %v3044_v11, %v1430_v14  ;;  %2806 = vmatpush.bf16.msra.mxu2 %v3521_v32  ;;  %v3509_v32 = vld [vmem:[%s4693_s3 + $0x188] sm:$0xff] }
 0x200   : > { %v1942_v39 = vunpack.c.l.b16 %v4238_v16  ;;  %2777 = vmatpush.bf16.msra.mxu1 %v3513_v34 }
 0x201   : > { %v1257_v42 = vmax.f32 %v1249_v25, 0.0  ;;  %1865 = vmatmul.bf16.gmra.mxu3 %v1371_v45  ;;  %1918 = vmatmul.bf16.vlgmr.msrb.gmra.mxu1 %v1371_v45  ;;  %v1451_v0 = vshrl.u32 %v1371_v45, 16  ;;  %v1454_v29 = vshll.u32 %v1371_v45, 16  ;;  %v3512_v25 = vld [vmem:[%s4693_s3 + $0x1a0] sm:$0xff]  ;;  %v1230_v62 = vpop.f32.mrf.mxu2 }
 0x202   : > { %v864_v24 = vpop.f32.mrf.mxu1  ;;  %v1963_v43 = vpack.c.b16 %v1942_v39, %v1939_v38  ;;  %v4302_v38 = vunpack.c.l.b16 %v1313_v61  ;;  %2194 = vmatpush.bf16.msra.mxu0 %v3478_v31  ;;  %v1315_v61 = vld [vmem:[#allocation3 + $0x54] sm:$0x8] }
 0x203   : > { %v1265_v60 = vpack.c.bf16 %v1257_v42, %v1257_v42  ;;  %v865_v35 = vadd.f32 %v864_v24, %v803_v58  ;;  %v1453_v46 = vrot.slane %v1451_v0, 7  ;;  %v1377_v0 = vpack.c.b16 %v4287_v27, %v4228_v28  ;;  %v3531_v24 = vld [vmem:[%s4693_s3 + $0x238] sm:$0xff]  ;;  %2807 = vmatpush.bf16.msra.mxu2 %v3520_v49 }
 0x204   : > { %2139 = vmatmul.bf16.vlgmr.msrb.gmra.mxu2 %v1963_v43  ;;  %v1310_v48 = vld [vmem:[#allocation3 + $0x34] sm:$0xf]  ;;  %2778 = vmatpush.bf16.msra.mxu1 %v3512_v25 }
 0x205   : > { %1297 = vst [vmem:[#allocation3 + $0x40] sm:$0xf] %v1265_v60  ;;  %v1238_v54 = vadd.f32 %v1225_v37, %v865_v35  ;;  %v4258_v59 = vunpack.c.l.b16 %v1310_v48  ;;  %v1456_v6 = vor.u32 %v1454_v29, %v1453_v46  ;;  %v3477_v60 = vld [vmem:[%s4693_s3 + $0x88] sm:$0xff]  ;;  %v3511_v35 = vld [vmem:[%s4693_s3 + $0x198] sm:$0xff]  ;;  %v1381_v46 = vpack.c.b16 %v4302_v38, %v4287_v27  ;;  %3571 = vmatpush.bf16.msra.mxu3 %v3531_v24  ;;  %v2219_v29 = vld [vmem:[#allocation3 + $0x8] sm:$0x1] }
 0x206   : > { %2195 = vmatpush.bf16.msra.mxu0 %v3477_v60  ;;  %v3508_v60 = vld [vmem:[%s4693_s3 + $0x180] sm:$0xff] }
 0x207   : > { %v1250_v2 = vadd.f32 %v4175_v52, %v1238_v54  ;;  %v1375_v55 = vpack.c.b16 %v4258_v59, %v4216_v19  ;;  %v4280_v41 = vsel %vm4013_vm10, %v3046_v4, %v1456_v6  ;;  %v3476_v4 = vld [vmem:[%s4693_s3 + $0x80] sm:$0xff]  ;;  %v3510_v6 = vld [vmem:[%s4693_s3 + $0x190] sm:$0xff]  ;;  %2808 = vmatpush.bf16.msra.mxu2 %v3519_v33 }
 0x208   : > { %v806_v3 = vpop.f32.mrf.mxu0  ;;  %v1945_v39 = vunpack.c.l.b16 %v4280_v41  ;;  %2779 = vmatpush.bf16.msra.mxu1 %v3511_v35 }
 0x209   : > { %v1258_v5 = vmax.f32 %v1250_v2, 0.0  ;;  %v1477_v8 = vshrl.u32 %v1375_v55, 16  ;;  %1894 = vmatmul.bf16.gmra.mxu0 %v1375_v55  ;;  %v1480_v10 = vshll.u32 %v1375_v55, 16  ;;  %v1498_v2 = vshrl.u32 %v1377_v0, 16 }
 0x20a   : > { %v867_v20 = vpop.f32.mrf.mxu1  ;;  %2196 = vmatpush.bf16.msra.mxu0 %v3476_v4  ;;  %v3529_v4 = vld [vmem:[%s4693_s3 + $0x228] sm:$0xff] }
 0x20b   : > { %v1266_v56 = vpack.c.bf16 %v1258_v5, %v1258_v5  ;;  %v1479_v23 = vrot.slane %v1477_v8, 7  ;;  %v868_v11 = vadd.f32 %v867_v20, %v806_v3  ;;  %v4327_v3 = vld [vmem:[#allocation3 + $0x14] sm:$0x1]  ;;  %v1524_v20 = vshrl.u32 %v1381_v46, 16 }
 0x20c   : > { %v1312_v36 = vld [vmem:[#allocation3 + $0x40] sm:$0xf]  ;;  %v3050_v7 = vrot.slane %v1498_v2, 11  ;;  %2780 = vmatpush.bf16.msra.mxu1 %v3510_v6  ;;  %v4376_v46 = vpack.c.b16 %v4216_v19, %v4216_v19  ;;  %v3516_v19 = vld [vmem:[%s4693_s3 + $0x1c0] sm:$0xff]  ;;  %v1364_v6 = vpack.c.b16 %v4204_v1, %v4204_v1 }
 0x20d   : > { %1298 = vst [vmem:[#allocation3 + $0x4c] sm:$0xf] %v1266_v56  ;;  %v1239_v14 = vadd.f32 %v1228_v18, %v868_v11  ;;  %v4285_v15 = vunpack.c.l.b16 %v1312_v36  ;;  %v1482_v26 = vor.u32 %v1480_v10, %v1479_v23  ;;  %v2222_v56 = vld [vmem:[#allocation3 + $0x1c] sm:$0xf]  ;;  %v2255_v23 = vunpack.c.l.b16 %v2219_v29  ;;  %v2223_v2 = vld [vmem:[#allocation3 + $0x20] sm:$0x1] }
 0x20e   : > { %v2257_v10 = vunpack.c.l.b16 %v4327_v3  ;;  %v3530_v36 = vld [vmem:[%s4693_s3 + $0x230] sm:$0xff]  ;;  %v4351_v0 = vunpack.c.l.b16 %v2222_v56  ;;  %2833 = vmatpush.bf16.msrb.mxu0 %v3531_v24  ;;  %v1366_v56 = vpack.c.b16 %v4214_v50, %v4214_v50  ;;  %v4398_v1 = vunpack.c.l.b16 %v2223_v2  ;;  %v2226_v2 = vld [vmem:[#allocation3 + $0x34] sm:$0xf] }
 0x20f   : > { %v1251_v58 = vadd.f32 %v4175_v52, %v1239_v14  ;;  %v1379_v45 = vpack.c.b16 %v4285_v15, %v4258_v59  ;;  %v4300_v37 = vsel %vm4013_vm10, %v3048_v9, %v1482_v26  ;;  %v2218_v9 = vld [vmem:[#allocation3 + $0x4] sm:$0xf]  ;;  %v2256_v26 = vunpack.c.l.b16 %v2220_v57  ;;  %3572 = vmatpush.bf16.msra.mxu3 %v3530_v36 }
 0x210   : > { %v1948_v12 = vunpack.c.l.b16 %v4300_v37  ;;  %v808_v43 = vpop.f32.mrf.mxu0  ;;  %v2254_v14 = vunpack.c.l.b16 %v2218_v9  ;;  %2781 = vmatpush.bf16.msra.mxu1 %v3509_v32  ;;  %v1362_v9 = vpack.c.b16 %v4200_v44, %v4200_v44 }
 0x211   : > { %v1259_v42 = vmax.f32 %v1251_v58, 0.0  ;;  %1870 = vmatmul.bf16.gmra.mxu3 %v1379_v45  ;;  %1923 = vmatmul.bf16.gmra.mxu1 %v1379_v45  ;;  %v1503_v17 = vshrl.u32 %v1379_v45, 16  ;;  %v1506_v18 = vshll.u32 %v1379_v45, 16  ;;  %v3052_v45 = vrot.slane %v1524_v20, 11 }
 0x212   : > { %v869_v40 = vpop.f32.mrf.mxu1  ;;  %v1966_v47 = vpack.c.b16 %v1948_v12, %v1945_v39  ;;  %v3517_v39 = vld [vmem:[%s4693_s3 + $0x1c8] sm:$0xff]  ;;  %v2278_v35 = vpack.c.b16 %v2256_v26, %v2254_v14  ;;  %v2282_v33 = vpack.c.b16 %v4351_v0, %v2256_v26  ;;  %2834 = vmatpush.bf16.msrb.mxu0 %v3530_v36  ;;  %v1412_v36 = vshrl.u32 %v1364_v6, 16 }
 0x213   : > { %v1267_v48 = vpack.c.bf16 %v1259_v42, %v1259_v42  ;;  %v870_v21 = vadd.f32 %v869_v40, %v808_v43  ;;  %v1505_v55 = vrot.slane %v1503_v17, 7  ;;  %v1317_v42 = vld [vmem:[#allocation3 + $0x60] sm:$0x8]  ;;  %v2280_v17 = vpack.c.b16 %v2257_v10, %v2255_v23  ;;  %3573 = vmatpush.bf16.msra.mxu3 %v3529_v4 }
 0x214   : > { %2144 = vmatmul.bf16.gmra.mxu2 %v1966_v47  ;;  %v1314_v54 = vld [vmem:[#allocation3 + $0x4c] sm:$0xf]  ;;  %v4361_v47 = vunpack.c.l.b16 %v1315_v61  ;;  %2782 = vmatpush.bf16.msra.mxu1 %v3508_v60  ;;  %v1438_v23 = vshrl.u32 %v4376_v46, 16 }
 0x215   : > { %1299 = vst [vmem:[#allocation3 + $0x58] sm:$0xf] %v1267_v48  ;;  %v1240_v51 = vadd.f32 %v1230_v62, %v870_v21  ;;  %v4325_v63 = vunpack.c.l.b16 %v1314_v54  ;;  %v1508_v34 = vor.u32 %v1506_v18, %v1505_v55  ;;  %v4372_v21 = vunpack.c.l.b16 %v1317_v42 }
 0x216   : > { %v1385_v29 = vpack.c.b16 %v4361_v47, %v4302_v38  ;;  %v2320_v55 = vshll.u32 %v2280_v17, 16  ;;  %v2314_v18 = vshll.u32 %v2278_v35, 16  ;;  %2835 = vmatpush.bf16.msrb.mxu0 %v3529_v4 }
 0x217   : > { %v1252_v5 = vadd.f32 %v4175_v52, %v1240_v51  ;;  %v1383_v8 = vpack.c.b16 %v4325_v63, %v4285_v15  ;;  %v3518_v52 = vld [vmem:[%s4693_s3 + $0x1d0] sm:$0xff]  ;;  %v4359_v43 = vsel %vm4013_vm10, %v3050_v7, %v1508_v34  ;;  %v1389_v20 = vpack.c.b16 %v4372_v21, %v4361_v47 }
 0x218   : > { %2809 = vmatpush.bf16.msra.mxu2 %v3518_v52  ;;  %v1951_v62 = vunpack.c.l.b16 %v4359_v43  ;;  %v1550_v7 = vshrl.u32 %v1385_v29, 16  ;;  %v2342_v52 = vshll.u32 %v2282_v33, 16  ;;  %v2316_v61 = vrot.slane %v2314_v18, 5 }
 0x219   : > { %v1260_v11 = vmax.f32 %v1252_v5, 0.0  ;;  %v1529_v13 = vshrl.u32 %v1383_v8, 16  ;;  %1899 = vmatmul.bf16.gmra.mxu0 %v1383_v8  ;;  %v1532_v58 = vshll.u32 %v1383_v8, 16  ;;  %v2311_v8 = vshrl.u32 %v2278_v35, 16  ;;  %v3528_v35 = vld [vmem:[%s4693_s3 + $0x220] sm:$0xff] }
 0x21a   : > { %v4402_v32 = vrot.slane %v2320_v55, 5  ;;  %v1576_v26 = vshrl.u32 %v1389_v20, 16  ;;  %v3054_v17 = vrot.slane %v1550_v7, 11  ;;  %v2344_v60 = vrot.slane %v2342_v52, 5  ;;  %3574 = vmatpush.bf16.msra.mxu3 %v3528_v35  ;;  %2836 = vmatpush.bf16.msrb.mxu0 %v3528_v35  ;;  %v2224_v20 = vld [vmem:[#allocation3 + $0x28] sm:$0xf] }
 0x21b   : > { %v1268_v31 = vpack.c.bf16 %v1260_v11, %v1260_v11  ;;  %v1531_v25 = vrot.slane %v1529_v13, 7  ;;  %v2339_v11 = vshrl.u32 %v2282_v33, 16  ;;  %v2313_v44 = vrot.slane %v2311_v8, 4 }
 0x21c   : > { %v1316_v12 = vld [vmem:[#allocation3 + $0x58] sm:$0xf]  ;;  %2810 = vmatpush.bf16.msra.mxu2 %v3517_v39  ;;  %v2284_v39 = vpack.c.b16 %v4398_v1, %v2257_v10  ;;  %v3056_v10 = vrot.slane %v1576_v26, 11  ;;  %v1415_v55 = vshll.u32 %v1364_v6, 16  ;;  %v1940_v8 = vunpack.c.h.b16 %v4220_v22 }
 0x21d   : > { %1300 = vst [vmem:[#allocation3 + $0x64] sm:$0xf] %v1268_v31  ;;  %v4355_v49 = vunpack.c.l.b16 %v1316_v12  ;;  %v1534_v40 = vor.u32 %v1532_v58, %v1531_v25  ;;  %v1407_v31 = vshrl.u32 %v1362_v9, 16  ;;  %v1320_v25 = vld [vmem:[#allocation3 + $0x70] sm:$0xf]  ;;  %v1433_v58 = vshrl.u32 %v1366_v56, 16 }
 0x21e   : > { %v2341_v12 = vrot.slane %v2339_v11, 4  ;;  %v2317_v33 = vor.u32 %v2316_v61, %v2313_v44  ;;  %v1376_v22 = vpack.c.b16 %v4285_v15, %v4285_v15  ;;  %v4435_v44 = vunpack.c.l.b16 %v2224_v20  ;;  %v3527_v15 = vld [vmem:[%s4693_s3 + $0x218] sm:$0xff] }
 0x21f   : > { %v1387_v48 = vpack.c.b16 %v4355_v49, %v4325_v63  ;;  %v4370_v24 = vsel %vm4013_vm10, %v3052_v45, %v1534_v40  ;;  %v1440_v45 = vrot.slane %v1438_v23, 7  ;;  %v3043_v9 = vrot.slane %v1407_v31, 11  ;;  %3575 = vmatpush.bf16.msra.mxu3 %v3527_v15  ;;  %2837 = vmatpush.bf16.msrb.mxu0 %v3527_v15 }
 0x220   : > { %v1954_v54 = vunpack.c.l.b16 %v4370_v24  ;;  %2811 = vmatpush.bf16.msra.mxu2 %v3516_v19  ;;  %v3045_v19 = vrot.slane %v1433_v58, 11  ;;  %v2345_v18 = vor.u32 %v2344_v60, %v2341_v12  ;;  %v2318_v56 = vrot.slane %v2317_v33, 4  ;;  %v2227_v12 = vld [vmem:[#allocation3 + $0x38] sm:$0x1] }
 0x221   : > { %1875 = vmatmul.bf16.gmra.mxu3 %v1387_v48  ;;  %1928 = vmatmul.bf16.gmra.mxu1 %v1387_v48  ;;  %v1555_v51 = vshrl.u32 %v1387_v48, 16  ;;  %v1558_v50 = vshll.u32 %v1387_v48, 16  ;;  %v1414_v48 = vrot.slane %v1412_v36, 7  ;;  %v4421_v23 = vunpack.c.l.b16 %v2226_v2 }
 0x222   : > { %v1969_v5 = vpack.c.b16 %v1954_v54, %v1951_v62  ;;  %v1943_v62 = vunpack.c.h.b16 %v4238_v16  ;;  %v1441_v54 = vshll.u32 %v4376_v46, 16  ;;  %v2346_v61 = vrot.slane %v2345_v18, 4 }
 0x223   : > { %v1557_v34 = vrot.slane %v1555_v51, 7  ;;  %v4414_v51 = vunpack.c.l.b16 %v1320_v25  ;;  %v2290_v25 = vpack.c.b16 %v4421_v23, %v4435_v44  ;;  %v1949_v18 = vunpack.c.h.b16 %v4300_v37 }
 0x224   : > { %2149 = vmatmul.bf16.gmra.mxu2 %v1969_v5  ;;  %v1318_v57 = vld [vmem:[#allocation3 + $0x64] sm:$0xf]  ;;  %v1443_v4 = vor.u32 %v1441_v54, %v1440_v45  ;;  %v2348_v5 = vshll.u32 %v2284_v39, 16  ;;  %v1964_v11 = vpack.c.b16 %v1943_v62, %v1940_v8  ;;  %v1374_v45 = vpack.c.b16 %v4287_v27, %v4287_v27 }
 0x225   : > { %v4400_v13 = vunpack.c.l.b16 %v1318_v57  ;;  %v1560_v40 = vor.u32 %v1558_v50, %v1557_v34  ;;  %v1417_v57 = vor.u32 %v1415_v55, %v1414_v48  ;;  %v1372_v50 = vpack.c.b16 %v4258_v59, %v4258_v59 }
 0x226   : > { %v1444_v36 = vsel %vm4013_vm10, %v3045_v19, %v1443_v4  ;;  %v1490_v39 = vshrl.u32 %v1376_v22, 16  ;;  %v2323_v59 = vsel %vm3925_vm6, %v2318_v56, %v4402_v32  ;;  %v2286_v27 = vpack.c.b16 %v4435_v44, %v4351_v0 }
 0x227   : > { %v1391_v14 = vpack.c.b16 %v4400_v13, %v4355_v49  ;;  %v4419_v16 = vsel %vm4013_vm10, %v3054_v17, %v1560_v40  ;;  %v1698_v6 = vpack.c.b16 %v4414_v51, %v4400_v13  ;;  %v1418_v31 = vsel %vm4013_vm10, %v3043_v9, %v1417_v57  ;;  %v2225_v17 = vld [vmem:[#allocation3 + $0x2c] sm:$0x1] }
 0x228   : > { %v1957_v34 = vunpack.c.l.b16 %v4419_v16  ;;  %v1944_v58 = vunpack.c.l.b16 %v1444_v36  ;;  %v1941_v40 = vunpack.c.l.b16 %v1418_v31  ;;  %v1464_v35 = vshrl.u32 %v1372_v50, 16  ;;  %v2230_v31 = vld [vmem:[#allocation3 + $0x4c] sm:$0xf] }
 0x229   : > { %v1581_v42 = vshrl.u32 %v1391_v14, 16  ;;  %1904 = vmatmul.bf16.gmra.mxu0 %v1391_v14  ;;  %v1584_v3 = vshll.u32 %v1391_v14, 16  ;;  %v2350_v14 = vrot.slane %v2348_v5, 5  ;;  %v4457_v48 = vunpack.c.l.b16 %v2227_v12 }
 0x22a   : > { %v2395_v62 = vshrl.u32 %v2290_v25, 16  ;;  %v2398_v54 = vshll.u32 %v2290_v25, 16  ;;  %v1965_v33 = vpack.c.b16 %v1944_v58, %v1941_v40  ;;  %v4459_v32 = vunpack.c.l.b16 %v2225_v17 }
 0x22b   : > { %v1583_v29 = vrot.slane %v1581_v42, 7  ;;  %v1370_v42 = vpack.c.b16 %v4228_v28, %v4228_v28  ;;  %v2351_v60 = vsel %vm3925_vm6, %v2346_v61, %v2350_v14  ;;  %v2584_v2 = vunpack.c.h.b16 %v2323_v59  ;;  %v2228_v61 = vld [vmem:[#allocation3 + $0x40] sm:$0xf] }
 0x22c   : > { %v2586_v28 = vunpack.c.l.b16 %v2351_v60  ;;  %v1466_v19 = vrot.slane %v1464_v35, 7  ;;  %v1493_v4 = vshll.u32 %v1376_v22, 16  ;;  %v2367_v5 = vshrl.u32 %v2286_v27, 16 }
 0x22d   : > { %v1586_v46 = vor.u32 %v1584_v3, %v1583_v29  ;;  %v1485_v29 = vshrl.u32 %v1374_v45, 16  ;;  %v1492_v3 = vrot.slane %v1490_v39, 7  ;;  %v1459_v55 = vshrl.u32 %v1370_v42, 16 }
 0x22e   : > { %v2370_v8 = vshll.u32 %v2286_v27, 16  ;;  %v2292_v20 = vpack.c.b16 %v4457_v48, %v4459_v32  ;;  %v2397_v9 = vrot.slane %v2395_v62, 4  ;;  %v2400_v57 = vrot.slane %v2398_v54, 5  ;;  %v3525_v62 = vld [vmem:[%s4693_s3 + $0x208] sm:$0xff] }
 0x22f   : > { %v4427_v7 = vsel %vm4013_vm10, %v3056_v10, %v1586_v46  ;;  %v2583_v10 = vunpack.c.l.b16 %v2323_v59  ;;  %v3526_v46 = vld [vmem:[%s4693_s3 + $0x210] sm:$0xff]  ;;  %v1467_v56 = vshll.u32 %v1372_v50, 16  ;;  %v1946_v22 = vunpack.c.h.b16 %v4280_v41 }
 0x230   : > { %v1960_v52 = vunpack.c.l.b16 %v4427_v7  ;;  %3576 = vmatpush.bf16.msra.mxu3 %v3526_v46  ;;  %2838 = vmatpush.bf16.msrb.mxu0 %v3526_v46  ;;  %v3047_v36 = vrot.slane %v1459_v55, 11  ;;  %v2288_v37 = vpack.c.b16 %v4459_v32, %v4398_v1  ;;  %v2369_v15 = vrot.slane %v2367_v5, 4  ;;  %v2229_v55 = vld [vmem:[#allocation3 + $0x44] sm:$0x1] }
 0x231   : > { %1933 = vmatmul.bf16.gmra.mxu1 %v1698_v6  ;;  %2168 = vmatmul.bf16.vlgmr.msrb.gmra.mxu3 %v1964_v11  ;;  %v3049_v6 = vrot.slane %v1485_v29, 11  ;;  %v1495_v11 = vor.u32 %v1493_v4, %v1492_v3  ;;  %v1469_v14 = vor.u32 %v1467_v56, %v1466_v19  ;;  %v1380_v50 = vpack.c.b16 %v4325_v63, %v4325_v63 }
 0x232   : > { %v1972_v26 = vpack.c.b16 %v1960_v52, %v1957_v34  ;;  %v1384_v34 = vpack.c.b16 %v4355_v49, %v4355_v49  ;;  %v2587_v52 = vunpack.c.h.b16 %v2351_v60  ;;  %v2607_v25 = vpack.c.b16 %v2586_v28, %v2583_v10 }
 0x233   : > { %v2401_v58 = vor.u32 %v2400_v57, %v2397_v9  ;;  %v2404_v49 = vshll.u32 %v2292_v20, 16  ;;  %v1382_v45 = vpack.c.b16 %v4361_v47, %v4361_v47  ;;  %v1967_v41 = vpack.c.b16 %v1949_v18, %v1946_v22  ;;  %v2231_v18 = vld [vmem:[#allocation3 + $0x50] sm:$0x1] }
 0x234   : > { %2154 = vmatmul.bf16.gmra.mxu2 %v1972_v26  ;;  %v2372_v26 = vrot.slane %v2370_v8, 5  ;;  %v1496_v39 = vsel %vm4013_vm10, %v3049_v6, %v1495_v11  ;;  %v1542_v12 = vshrl.u32 %v1384_v34, 16  ;;  %v4478_v59 = vunpack.c.l.b16 %v2228_v61  ;;  %3577 = vmatpush.bf16.msra.mxu3 %v3525_v62 }
 0x235   : > { %v4482_v42 = vpack.c.b16 %v4414_v51, %v4414_v51  ;;  %v2608_v17 = vpack.c.b16 %v2587_v52, %v2584_v2  ;;  %v2376_v63 = vshll.u32 %v2288_v37, 16  ;;  %v4484_v40 = vunpack.c.l.b16 %v2230_v31  ;;  %2839 = vmatpush.bf16.msrb.mxu0 %v3525_v62 }
 0x236   : > { %v1470_v47 = vsel %vm4013_vm10, %v3047_v36, %v1469_v14  ;;  %v2373_v60 = vor.u32 %v2372_v26, %v2369_v15  ;;  %v1378_v35 = vpack.c.b16 %v4302_v38, %v4302_v38  ;;  %v1516_v27 = vshrl.u32 %v1380_v50, 16 }
 0x237   : > { %v1950_v51 = vunpack.c.l.b16 %v1496_v39  ;;  %v2402_v54 = vrot.slane %v2401_v58, 4  ;;  %v1537_v29 = vshrl.u32 %v1382_v45, 16  ;;  %v1544_v3 = vrot.slane %v1542_v12, 7  ;;  %v2234_v45 = vld [vmem:[#allocation3 + $0x64] sm:$0xf] }
 0x238   : > { %v2294_v10 = vpack.c.b16 %v4478_v59, %v4421_v23  ;;  %v1594_v28 = vshrl.u32 %v4482_v42, 16  ;;  %v1947_v2 = vunpack.c.l.b16 %v1470_v47  ;;  %v2378_v38 = vrot.slane %v2376_v63, 5 }
 0x239   : > { %2197 = vmatmul.bf16.vlgmr.msra.gmra.mxu0 %v1965_v33  ;;  %v2406_v33 = vrot.slane %v2404_v49, 5  ;;  %v2298_v19 = vpack.c.b16 %v4484_v40, %v4478_v59  ;;  %v2374_v4 = vrot.slane %v2373_v60, 4  ;;  %v1511_v5 = vshrl.u32 %v1378_v35, 16 }
 0x23a   : > { %v1518_v8 = vrot.slane %v1516_v27, 7  ;;  %v1545_v46 = vshll.u32 %v1384_v34, 16  ;;  %v1968_v20 = vpack.c.b16 %v1950_v51, %v1947_v2  ;;  %v1519_v57 = vshll.u32 %v1380_v50, 16  ;;  %v3524_v50 = vld [vmem:[%s4693_s3 + $0x200] sm:$0xff] }
 0x23b   : > { %v2407_v9 = vsel %vm3925_vm6, %v2402_v54, %v2406_v33  ;;  %v3053_v56 = vrot.slane %v1537_v29, 11  ;;  %v4500_v11 = vunpack.c.l.b16 %v2229_v55  ;;  %v2423_v22 = vshrl.u32 %v2294_v10, 16  ;;  %3578 = vmatpush.bf16.msra.mxu3 %v3524_v50  ;;  %2840 = vmatpush.bf16.msrb.mxu0 %v3524_v50 }
 0x23c   : > { %v1547_v6 = vor.u32 %v1545_v46, %v1544_v3  ;;  %v2426_v52 = vshll.u32 %v2294_v10, 16  ;;  %v4502_v36 = vunpack.c.l.b16 %v2231_v18  ;;  %v2451_v37 = vshrl.u32 %v2298_v19, 16 }
 0x23d   : > { %v2454_v61 = vshll.u32 %v2298_v19, 16  ;;  %v1955_v14 = vunpack.c.h.b16 %v4370_v24  ;;  %v2379_v34 = vsel %vm3925_vm6, %v2374_v4, %v2378_v38  ;;  %v3051_v15 = vrot.slane %v1511_v5, 11 }
 0x23e   : > { %v1521_v26 = vor.u32 %v1519_v57, %v1518_v8  ;;  %v1596_v31 = vrot.slane %v1594_v28, 7  ;;  %v1952_v58 = vunpack.c.h.b16 %v4359_v43  ;;  %v2592_v49 = vunpack.c.l.b16 %v2407_v9  ;;  %v2232_v43 = vld [vmem:[#allocation3 + $0x58] sm:$0xf] }
 0x23f   : > { %v2296_v24 = vpack.c.b16 %v4500_v11, %v4457_v48  ;;  %v2425_v39 = vrot.slane %v2423_v22, 4  ;;  %v2428_v12 = vrot.slane %v2426_v52, 5  ;;  %v2589_v63 = vunpack.c.l.b16 %v2379_v34 }
 0x240   : > { %v2300_v47 = vpack.c.b16 %v4502_v36, %v4500_v11  ;;  %v2456_v60 = vrot.slane %v2454_v61, 5  ;;  %v1970_v35 = vpack.c.b16 %v1955_v14, %v1952_v58  ;;  %v2593_v27 = vunpack.c.h.b16 %v2407_v9  ;;  %v2233_v14 = vld [vmem:[#allocation3 + $0x5c] sm:$0x1] }
 0x241   : > { %2173 = vmatmul.bf16.gmra.mxu3 %v1967_v41  ;;  %2783 = vmatmul.bf16.vlgmr.msra.gmra.mxu1 %v2607_v25  ;;  %v1597_v25 = vshll.u32 %v4482_v42, 16  ;;  %v1548_v41 = vsel %vm4013_vm10, %v3053_v56, %v1547_v6  ;;  %v2453_v42 = vrot.slane %v2451_v37, 4  ;;  %v1522_v62 = vsel %vm4013_vm10, %v3051_v15, %v1521_v26  ;;  %v2235_v56 = vld [vmem:[#allocation3 + $0x68] sm:$0x1] }
 0x242   : > { %v4520_v51 = vunpack.c.l.b16 %v2234_v45  ;;  %v2610_v54 = vpack.c.b16 %v2592_v49, %v2589_v63  ;;  %v1956_v33 = vunpack.c.l.b16 %v1548_v41  ;;  %v1386_v3 = vpack.c.b16 %v4372_v21, %v4372_v21 }
 0x243   : > { %v2429_v10 = vor.u32 %v2428_v12, %v2425_v39  ;;  %v2432_v28 = vshll.u32 %v2296_v24, 16  ;;  %v1388_v2 = vpack.c.b16 %v4400_v13, %v4400_v13  ;;  %v4526_v38 = vunpack.c.l.b16 %v2232_v43 }
 0x244   : > { %2812 = vmatmul.bf16.vlgmr.msra.gmra.mxu2 %v2608_v17  ;;  %v1319_v17 = vld [vmem:[#allocation3 + $0x6c] sm:$0x8]  ;;  %v2590_v55 = vunpack.c.h.b16 %v2379_v34  ;;  %v1953_v19 = vunpack.c.l.b16 %v1522_v62  ;;  %v2457_v4 = vor.u32 %v2456_v60, %v2453_v42  ;;  %v2460_v5 = vshll.u32 %v2300_v47, 16 }
 0x245   : > { %v1359_v29 = vunpack.c.l.b16 %v1319_v17  ;;  %v4530_v8 = vpack.c.b16 %v4435_v44, %v4435_v44  ;;  %v2285_v46 = vpack.c.b16 %v4459_v32, %v4459_v32  ;;  %v1961_v21 = vunpack.c.h.b16 %v4427_v7 }
 0x246   : > { %v2306_v13 = vpack.c.b16 %v4520_v51, %v4526_v38  ;;  %v2611_v18 = vpack.c.b16 %v2593_v27, %v2590_v55  ;;  %v1958_v9 = vunpack.c.h.b16 %v4419_v16  ;;  %v2430_v6 = vrot.slane %v2429_v10, 4 }
 0x247   : > { %v1390_v57 = vpack.c.b16 %v1359_v29, %v1359_v29  ;;  %v2434_v22 = vrot.slane %v2432_v28, 5  ;;  %v1563_v52 = vshrl.u32 %v1386_v3, 16  ;;  %v1568_v44 = vshrl.u32 %v1388_v2, 16 }
 0x248   : > { %v2458_v37 = vrot.slane %v2457_v4, 4  ;;  %v2462_v61 = vrot.slane %v2460_v5, 5  ;;  %v2302_v7 = vpack.c.b16 %v4526_v38, %v4484_v40  ;;  %v2291_v34 = vpack.c.b16 %v4478_v59, %v4478_v59 }
 0x249   : > { %2202 = vmatmul.bf16.gmra.mxu0 %v1968_v20  ;;  %v1971_v20 = vpack.c.b16 %v1956_v33, %v1953_v19  ;;  %v1973_v15 = vpack.c.b16 %v1961_v21, %v1958_v9  ;;  %v4542_v26 = vunpack.c.l.b16 %v2235_v56  ;;  %v2507_v16 = vshrl.u32 %v2306_v13, 16 }
 0x24a   : > { %v2510_v50 = vshll.u32 %v2306_v13, 16  ;;  %v1571_v58 = vshll.u32 %v1388_v2, 16  ;;  %v1589_v49 = vshrl.u32 %v1390_v57, 16  ;;  %v1599_v45 = vor.u32 %v1597_v25, %v1596_v31 }
 0x24b   : > { %v2287_v41 = vpack.c.b16 %v4421_v23, %v4421_v23  ;;  %v2435_v24 = vsel %vm3925_vm6, %v2430_v6, %v2434_v22  ;;  %v3055_v39 = vrot.slane %v1563_v52, 11  ;;  %v1570_v12 = vrot.slane %v1568_v44, 7 }
 0x24c   : > { %v4548_v17 = vunpack.c.l.b16 %v2233_v14  ;;  %v2463_v59 = vsel %vm3925_vm6, %v2458_v37, %v2462_v61  ;;  %v2479_v63 = vshrl.u32 %v2302_v7, 16  ;;  %v2409_v47 = vshrl.u32 %v2291_v34, 16 }
 0x24d   : > { %v2412_v42 = vshll.u32 %v2291_v34, 16  ;;  %v2482_v25 = vshll.u32 %v2302_v7, 16  ;;  %v2509_v60 = vrot.slane %v2507_v16, 4  ;;  %v2512_v23 = vrot.slane %v2510_v50, 5 }
 0x24e   : > { %v2308_v31 = vpack.c.b16 %v4542_v26, %v4548_v17  ;;  %v2595_v43 = vunpack.c.l.b16 %v2435_v24  ;;  %v2381_v27 = vshrl.u32 %v2287_v41, 16  ;;  %v2384_v62 = vshll.u32 %v2287_v41, 16 }
 0x24f   : > { %v2596_v33 = vunpack.c.h.b16 %v2435_v24  ;;  %v1573_v29 = vor.u32 %v1571_v58, %v1570_v12  ;;  %v2304_v3 = vpack.c.b16 %v4548_v17, %v4502_v36  ;;  %v2481_v10 = vrot.slane %v2479_v63, 4 }
 0x250   : > { %v2293_v28 = vpack.c.b16 %v4500_v11, %v4500_v11  ;;  %v2411_v2 = vrot.slane %v2409_v47, 4  ;;  %v2414_v55 = vrot.slane %v2412_v42, 5  ;;  %v2484_v19 = vrot.slane %v2482_v25, 5 }
 0x251   : > { %2178 = vmatmul.bf16.gmra.mxu3 %v1970_v35  ;;  %2788 = vmatmul.bf16.gmra.mxu1 %v2610_v54  ;;  %v3057_v35 = vrot.slane %v1589_v49, 11  ;;  %v2598_v54 = vunpack.c.l.b16 %v2463_v59  ;;  %v2513_v4 = vor.u32 %v2512_v23, %v2509_v60  ;;  %v2516_v5 = vshll.u32 %v2308_v31, 16 }
 0x252   : > { %v2289_v21 = vpack.c.b16 %v4457_v48, %v4457_v48  ;;  %v2599_v13 = vunpack.c.h.b16 %v2463_v59  ;;  %v2279_v9 = vpack.c.b16 %v4351_v0, %v4351_v0  ;;  %v1574_v56 = vsel %vm4013_vm10, %v3055_v39, %v1573_v29 }
 0x253   : > { %v2613_v57 = vpack.c.b16 %v2598_v54, %v2595_v43  ;;  %v1600_v11 = vsel %vm4013_vm10, %v3057_v35, %v1599_v45  ;;  %v2488_v6 = vshll.u32 %v2304_v3, 16  ;;  %v2415_v22 = vor.u32 %v2414_v55, %v2411_v2 }
 0x254   : > { %2817 = vmatmul.bf16.gmra.mxu2 %v2611_v18  ;;  %v2383_v18 = vrot.slane %v2381_v27, 4  ;;  %v2418_v52 = vshll.u32 %v2293_v28, 16  ;;  %v2353_v44 = vshrl.u32 %v4530_v8, 16  ;;  %v2356_v48 = vshll.u32 %v4530_v8, 16 }
 0x255   : > { %v2485_v37 = vor.u32 %v2484_v19, %v2481_v10  ;;  %v2514_v61 = vrot.slane %v2513_v4, 4  ;;  %v2518_v14 = vrot.slane %v2516_v5, 5  ;;  %v2390_v0 = vshll.u32 %v2289_v21, 16 }
 0x256   : > { %v2614_v7 = vpack.c.b16 %v2599_v13, %v2596_v33  ;;  %v2325_v16 = vshrl.u32 %v2279_v9, 16  ;;  %v2328_v50 = vshll.u32 %v2279_v9, 16  ;;  %v1959_v58 = vunpack.c.l.b16 %v1574_v56  ;;  %v2236_v13 = vld [vmem:[#allocation3 + $0x70] sm:$0xf] }
 0x257   : > { %v1962_v53 = vunpack.c.l.b16 %v1600_v11  ;;  %v2490_v49 = vrot.slane %v2488_v6, 5  ;;  %v2299_v45 = vpack.c.b16 %v4526_v38, %v4526_v38  ;;  %v2416_v41 = vrot.slane %v2415_v22, 4 }
 0x258   : > { %v2420_v24 = vrot.slane %v2418_v52, 5  ;;  %v2355_v8 = vrot.slane %v2353_v44, 4  ;;  %v2486_v39 = vrot.slane %v2485_v37, 4  ;;  %v2519_v12 = vsel %vm3925_vm6, %v2514_v61, %v2518_v14 }
 0x259   : > { %2207 = vmatmul.bf16.gmra.mxu0 %v1971_v20  ;;  %v2386_v20 = vrot.slane %v2384_v62, 5  ;;  %v2392_v59 = vrot.slane %v2390_v0, 5  ;;  %v2281_v63 = vpack.c.b16 %v4398_v1, %v4398_v1  ;;  %v2327_v42 = vrot.slane %v2325_v16, 4  ;;  %v2237_v16 = vld [vmem:[#allocation3 + $0x74] sm:$0x1] }
 0x25a   : > { %v2330_v31 = vrot.slane %v2328_v50, 5  ;;  %v2295_v25 = vpack.c.b16 %v4484_v40, %v4484_v40  ;;  %v1974_v38 = vpack.c.b16 %v1962_v53, %v1959_v58  ;;  %v2465_v60 = vshrl.u32 %v2299_v45, 16 }
 0x25b   : > { %v2387_v34 = vor.u32 %v2386_v20, %v2383_v18  ;;  %v2468_v23 = vshll.u32 %v2299_v45, 16  ;;  %v2421_v43 = vsel %vm3925_vm6, %v2416_v41, %v2420_v24  ;;  %v2362_v27 = vshll.u32 %v2285_v46, 16 }
 0x25c   : > { %v2491_v1 = vsel %vm3925_vm6, %v2486_v39, %v2490_v49  ;;  %v2604_v62 = vunpack.c.l.b16 %v2519_v12  ;;  %v2334_v54 = vshll.u32 %v2281_v63, 16  ;;  %v2331_v33 = vor.u32 %v2330_v31, %v2327_v42 }
 0x25d   : > { %v2388_v47 = vrot.slane %v2387_v34, 4  ;;  %v2437_v29 = vshrl.u32 %v2295_v25, 16  ;;  %v2440_v3 = vshll.u32 %v2295_v25, 16  ;;  %v2594_v10 = vunpack.c.l.b16 %v2421_v43 }
 0x25e   : > { %v2301_v28 = vpack.c.b16 %v4548_v17, %v4548_v17  ;;  %v2467_v2 = vrot.slane %v2465_v60, 4  ;;  %v2470_v55 = vrot.slane %v2468_v23, 5  ;;  %v2364_v46 = vrot.slane %v2362_v27, 5 }
 0x25f   : > { %v2393_v40 = vsel %vm3925_vm6, %v2388_v47, %v2392_v59  ;;  %v2601_v19 = vunpack.c.l.b16 %v2491_v1  ;;  %v2605_v5 = vunpack.c.h.b16 %v2519_v12  ;;  %v2336_v21 = vrot.slane %v2334_v54, 5 }
 0x260   : > { %v2591_v4 = vunpack.c.l.b16 %v2393_v40  ;;  %v2332_v18 = vrot.slane %v2331_v33, 4  ;;  %v2297_v20 = vpack.c.b16 %v4502_v36, %v4502_v36  ;;  %v2439_v9 = vrot.slane %v2437_v29, 4 }
 0x261   : > { %2183 = vmatmul.bf16.gmra.mxu3 %v1973_v15  ;;  %2793 = vmatmul.bf16.gmra.mxu1 %v2613_v57  ;;  %v2358_v15 = vrot.slane %v2356_v48, 5  ;;  %v2442_v57 = vrot.slane %v2440_v3, 5  ;;  %v2616_v56 = vpack.c.b16 %v2604_v62, %v2601_v19  ;;  %v2471_v6 = vor.u32 %v2470_v55, %v2467_v2 }
 0x262   : > { %v2612_v11 = vpack.c.b16 %v2594_v10, %v2591_v4  ;;  %v2474_v22 = vshll.u32 %v2301_v28, 16  ;;  %v2602_v17 = vunpack.c.h.b16 %v2491_v1  ;;  %v2276_v44 = vunpack.c.l.b16 %v2236_v13 }
 0x263   : > { %v2359_v35 = vor.u32 %v2358_v15, %v2355_v8  ;;  %v2337_v37 = vsel %vm3925_vm6, %v2332_v18, %v2336_v21  ;;  %v2443_v61 = vor.u32 %v2442_v57, %v2439_v9  ;;  %v2446_v14 = vshll.u32 %v2297_v20, 16 }
 0x264   : > { %2822 = vmatmul.bf16.gmra.mxu2 %v2614_v7  ;;  %v2617_v48 = vpack.c.b16 %v2605_v5, %v2602_v17  ;;  %v2472_v0 = vrot.slane %v2471_v6, 4  ;;  %v2476_v7 = vrot.slane %v2474_v22, 5  ;;  %v2303_v50 = vpack.c.b16 %v4520_v51, %v4520_v51 }
 0x265   : > { %v2360_v32 = vrot.slane %v2359_v35, 4  ;;  %v2307_v58 = vpack.c.b16 %v2276_v44, %v2276_v44  ;;  %v2585_v53 = vunpack.c.l.b16 %v2337_v37  ;;  %v2444_v45 = vrot.slane %v2443_v61, 4 }
 0x266   : > { %v2448_v41 = vrot.slane %v2446_v14, 5  ;;  %v2477_v15 = vsel %vm3925_vm6, %v2472_v0, %v2476_v7  ;;  %v2277_v39 = vunpack.c.l.b16 %v2237_v16  ;;  %v2493_v12 = vshrl.u32 %v2303_v50, 16 }
 0x267   : > { %v2365_v52 = vsel %vm3925_vm6, %v2360_v32, %v2364_v46  ;;  %v2496_v59 = vshll.u32 %v2303_v50, 16  ;;  %v2521_v63 = vshrl.u32 %v2307_v58, 16  ;;  %v2524_v47 = vshll.u32 %v2307_v58, 16 }
 0x268   : > { %v2588_v36 = vunpack.c.l.b16 %v2365_v52  ;;  %v2449_v42 = vsel %vm3925_vm6, %v2444_v45, %v2448_v41  ;;  %v2600_v51 = vunpack.c.l.b16 %v2477_v15  ;;  %v2305_v31 = vpack.c.b16 %v4542_v26, %v4542_v26 }
 0x269   : > { %2212 = vmatmul.bf16.gmra.mxu0 %v1974_v38  ;;  %v2309_v25 = vpack.c.b16 %v2277_v39, %v2277_v39  ;;  %v2495_v60 = vrot.slane %v2493_v12, 4  ;;  %v2498_v23 = vrot.slane %v2496_v59, 5  ;;  %v2523_v43 = vrot.slane %v2521_v63, 4 }
 0x26a   : > { %v2609_v8 = vpack.c.b16 %v2588_v36, %v2585_v53  ;;  %v2526_v35 = vrot.slane %v2524_v47, 5  ;;  %v2597_v27 = vunpack.c.l.b16 %v2449_v42  ;;  %v2502_v3 = vshll.u32 %v2305_v31, 16 }
 0x26b   : > { %v2499_v29 = vor.u32 %v2498_v23, %v2495_v60  ;;  %v2530_v28 = vshll.u32 %v2309_v25, 16 }
 0x26c   : > { %v2615_v33 = vpack.c.b16 %v2600_v51, %v2597_v27  ;;  %v2527_v10 = vor.u32 %v2526_v35, %v2523_v43  ;;  %v2504_v26 = vrot.slane %v2502_v3, 5 }
 0x26d   : > { %v2500_v55 = vrot.slane %v2499_v29, 4  ;;  %v2532_v46 = vrot.slane %v2530_v28, 5 }
 0x26e   : > { %v2528_v32 = vrot.slane %v2527_v10, 4 }
 0x26f   : > { %v2505_v20 = vsel %vm3925_vm6, %v2500_v55, %v2504_v26 }
 0x270   : > { %v2533_v9 = vsel %vm3925_vm6, %v2528_v32, %v2532_v46  ;;  %v2603_v57 = vunpack.c.l.b16 %v2505_v20 }
 0x271   : > { %2798 = vmatmul.bf16.gmra.mxu1 %v2616_v56  ;;  %2846 = vmatmul.bf16.vlgmr.msra.gmra.mxu3 %v2612_v11  ;;  %v2606_v56 = vunpack.c.l.b16 %v2533_v9 }
 0x273   : > { %v2618_v52 = vpack.c.b16 %v2606_v56, %v2603_v57 }
 0x274   : > { %v1861_v34 = vpop.f32.mrf.mxu3  ;;  %2827 = vmatmul.bf16.gmra.mxu2 %v2617_v48 }
 0x276   : > { %v1890_v49 = vpop.f32.mrf.mxu0 }
 0x277   : > { %v1891_v24 = vadd.f32 %v1890_v49, %v1861_v34 }
 0x279   : > { %2841 = vmatmul.bf16.vlgmr.msrb.gmra.mxu0 %v2609_v8 }
 0x27c   : > { %v1863_v38 = vpop.f32.mrf.mxu3 }
 0x27e   : > { %v1892_v1 = vpop.f32.mrf.mxu0  ;;  %v1919_v62 = vpop.f32.mrf.mxu1 }
 0x27f   : > { %v1893_v54 = vadd.f32 %v1892_v1, %v1863_v38  ;;  %v1920_v40 = vadd.f32 %v1919_v62, %v1891_v24 }
 0x281   : > { %2851 = vmatmul.bf16.gmra.mxu3 %v2615_v33 }
 0x284   : > { %v1866_v2 = vpop.f32.mrf.mxu3 }
 0x286   : > { %v1895_v19 = vpop.f32.mrf.mxu0  ;;  %v1921_v4 = vpop.f32.mrf.mxu1 }
 0x287   : > { %v4601_v5 = vadd.f32 %v1895_v19, %v1866_v2  ;;  %v1922_v21 = vadd.f32 %v1921_v4, %v1893_v54  ;;  %v2140_v13 = vpop.f32.mrf.mxu2 }
 0x288   : > { %v2141_v18 = vadd.f32 %v2140_v13, %v1920_v40 }
 0x28c   : > { %v1868_v11 = vpop.f32.mrf.mxu3 }
 0x28e   : > { %v1897_v6 = vpop.f32.mrf.mxu0  ;;  %v1924_v36 = vpop.f32.mrf.mxu1 }
 0x28f   : > { %v1898_v22 = vadd.f32 %v1897_v6, %v1868_v11  ;;  %v2142_v17 = vpop.f32.mrf.mxu2  ;;  %v1925_v4 = vadd.f32 %v1924_v36, %v4601_v5 }
 0x290   : > { %v2143_v44 = vadd.f32 %v2142_v17, %v1922_v21 }
 0x291   : > { %2856 = vmatmul.bf16.gmra.mxu3 %v2618_v52 }
 0x294   : > { %v1871_v48 = vpop.f32.mrf.mxu3 }
 0x296   : > { %v1900_v37 = vpop.f32.mrf.mxu0  ;;  %v1926_v16 = vpop.f32.mrf.mxu1 }
 0x297   : > { %v4607_v61 = vadd.f32 %v1900_v37, %v1871_v48  ;;  %v2145_v14 = vpop.f32.mrf.mxu2  ;;  %v1927_v11 = vadd.f32 %v1926_v16, %v1898_v22 }
 0x298   : > { %v2146_v13 = vadd.f32 %v2145_v14, %v1925_v4 }
 0x29c   : > { %v1873_v0 = vpop.f32.mrf.mxu3 }
 0x29e   : > { %v1902_v7 = vpop.f32.mrf.mxu0  ;;  %v1929_v45 = vpop.f32.mrf.mxu1 }
 0x29f   : > { %v4609_v34 = vadd.f32 %v1902_v7, %v1873_v0  ;;  %v2147_v30 = vpop.f32.mrf.mxu2 }
 0x2a0   : > { %v2148_v5 = vadd.f32 %v2147_v30, %v1927_v11  ;;  %v1930_v30 = vadd.f32 %v1929_v45, %v4607_v61 }
 0x2a4   : > { %v1876_v50 = vpop.f32.mrf.mxu3 }
 0x2a6   : > { %v1905_v58 = vpop.f32.mrf.mxu0  ;;  %v4619_v59 = vpop.f32.mrf.mxu1 }
 0x2a7   : > { %v4611_v53 = vadd.f32 %v1905_v58, %v1876_v50  ;;  %v4613_v49 = vpop.f32.mrf.mxu2 }
 0x2ac   : > { %v1878_v41 = vpop.f32.mrf.mxu3 }
 0x2ae   : > { %v1907_v24 = vpop.f32.mrf.mxu0  ;;  %v4623_v60 = vpop.f32.mrf.mxu1 }
 0x2af   : > { %v4615_v8 = vadd.f32 %v1907_v24, %v1878_v41  ;;  %v4617_v15 = vpop.f32.mrf.mxu2 }
 0x2b4   : > { %v2169_v39 = vpop.f32.mrf.mxu3 }
 0x2b5   : > { %v2170_v12 = vadd.f32 %v2169_v39, %v2141_v18 }
 0x2b6   : > { %v2198_v63 = vpop.f32.mrf.mxu0  ;;  %v4627_v27 = vpop.f32.mrf.mxu1 }
 0x2b7   : > { %v2199_v47 = vadd.f32 %v2198_v63, %v2170_v12  ;;  %v4621_v31 = vpop.f32.mrf.mxu2 }
 0x2bc   : > { %v2171_v42 = vpop.f32.mrf.mxu3 }
 0x2bd   : > { %v2172_v51 = vadd.f32 %v2171_v42, %v2143_v44  ;;  %v4645_v44 = vld [vmem:[%s4694_s4] ss:$0 sm:$0xff] }
 0x2be   : > { %v2200_v25 = vpop.f32.mrf.mxu0  ;;  %v2784_v40 = vpop.f32.mrf.mxu1 }
 0x2bf   : > { %v2201_v38 = vadd.f32 %v2200_v25, %v2172_v51  ;;  %v4625_v35 = vpop.f32.mrf.mxu2  ;;  %v2151_v51 = vadd.f32 %v4613_v49, %v1930_v30 }
 0x2c4   : > { %v2174_v23 = vpop.f32.mrf.mxu3 }
 0x2c5   : > { %v2175_v20 = vadd.f32 %v2174_v23, %v2146_v13 }
 0x2c6   : > { %v2203_v43 = vpop.f32.mrf.mxu0  ;;  %v2786_v28 = vpop.f32.mrf.mxu1 }
 0x2c7   : > { %v2813_v54 = vpop.f32.mrf.mxu2  ;;  %v2204_v6 = vadd.f32 %v2203_v43, %v2175_v20 }
 0x2c8   : > { %v2814_v17 = vadd.f32 %v2813_v54, %v2784_v40 }
 0x2cc   : > { %v2176_v1 = vpop.f32.mrf.mxu3 }
 0x2cd   : > { %v2177_v14 = vadd.f32 %v2176_v1, %v2148_v5 }
 0x2ce   : > { %v2205_v62 = vpop.f32.mrf.mxu0  ;;  %v2789_v46 = vpop.f32.mrf.mxu1 }
 0x2cf   : > { %v2815_v3 = vpop.f32.mrf.mxu2  ;;  %v2206_v39 = vadd.f32 %v2205_v62, %v2177_v14 }
 0x2d0   : > { %v2816_v12 = vadd.f32 %v2815_v3, %v2786_v28  ;;  %v1932_v28 = vadd.f32 %v4619_v59, %v4609_v34  ;;  %v1935_v34 = vadd.f32 %v4623_v60, %v4611_v53  ;;  %v1937_v53 = vadd.f32 %v4627_v27, %v4615_v8 }
 0x2d4   : > { %v2179_v33 = vpop.f32.mrf.mxu3 }
 0x2d5   : > { %v2180_v43 = vadd.f32 %v2179_v33, %v2151_v51  ;;  %v2153_v33 = vadd.f32 %v4617_v15, %v1932_v28  ;;  %v2156_v15 = vadd.f32 %v4621_v31, %v1935_v34  ;;  %v2158_v31 = vadd.f32 %v4625_v35, %v1937_v53 }
 0x2d6   : > { %v2208_v29 = vpop.f32.mrf.mxu0  ;;  %v2791_v9 = vpop.f32.mrf.mxu1 }
 0x2d7   : > { %v2818_v26 = vpop.f32.mrf.mxu2 }
 0x2d8   : > { %v2819_v57 = vadd.f32 %v2818_v26, %v2789_v46  ;;  %v2209_v26 = vadd.f32 %v2208_v29, %v2180_v43 }
 0x2dc   : > { %v4629_v10 = vpop.f32.mrf.mxu3 }
 0x2de   : > { %v4631_v2 = vpop.f32.mrf.mxu0  ;;  %v2794_v41 = vpop.f32.mrf.mxu1 }
 0x2df   : > { %v2820_v18 = vpop.f32.mrf.mxu2 }
 0x2e0   : > { %v2821_v22 = vadd.f32 %v2820_v18, %v2791_v9 }
 0x2e4   : > { %v4633_v55 = vpop.f32.mrf.mxu3 }
 0x2e6   : > { %v4635_v32 = vpop.f32.mrf.mxu0  ;;  %v2796_v4 = vpop.f32.mrf.mxu1 }
 0x2e7   : > { %v2823_v50 = vpop.f32.mrf.mxu2 }
 0x2e8   : > { %v2824_v61 = vadd.f32 %v2823_v50, %v2794_v41 }
 0x2ec   : > { %v4637_v19 = vpop.f32.mrf.mxu3 }
 0x2ee   : > { %v4640_v21 = vpop.f32.mrf.mxu0 }
 0x2ef   : > { %v2825_v40 = vpop.f32.mrf.mxu2 }
 0x2f0   : > { %v2826_v20 = vadd.f32 %v2825_v40, %v2796_v4 }
 0x2f4   : > { %v2847_v56 = vpop.f32.mrf.mxu3 }
 0x2f5   : > { %v2848_v52 = vadd.f32 %v2847_v56, %v2819_v57 }
 0x2f6   : > { %v2842_v48 = vpop.f32.mrf.mxu0 }
 0x2f7   : > { %v2864_v37 = vadd.f32 %v2848_v52, %v2204_v6  ;;  %v2843_v36 = vadd.f32 %v2842_v48, %v2814_v17  ;;  %v2828_v56 = vpop.f32.mrf.mxu2  ;;  %v2799_v6 = vpop.f32.mrf.mxu1 }
 0x2f8   : > { %v2829_v52 = vadd.f32 %v2828_v56, %v2799_v6 }
 0x2f9   : > { %v2876_v0 = vadd.f32 %v4645_v44, %v2864_v37  ;;  %v2862_v7 = vadd.f32 %v2843_v36, %v2199_v47 }
 0x2fb   : > { %v2884_v16 = vmax.f32 %v2876_v0, 0.0  ;;  %v2874_v58 = vadd.f32 %v4645_v44, %v2862_v7 }
 0x2fc   : > { %v2849_v24 = vpop.f32.mrf.mxu3 }
 0x2fd   : > { %2892 = vst [vmem:[%s4653_s10 + $0x10] sm:$0xff] %v2884_v16  ;;  %v2882_v63 = vmax.f32 %v2874_v58, 0.0  ;;  %v2850_v47 = vadd.f32 %v2849_v24, %v2821_v22 }
 0x2fe   : > { %v2844_v42 = vpop.f32.mrf.mxu0 }
 0x2ff   : > { %2890 = vst [vmem:[%s4653_s10] sm:$0xff] %v2882_v63  ;;  %v2865_v25 = vadd.f32 %v2850_v47, %v2206_v39  ;;  %v2845_v23 = vadd.f32 %v2844_v42, %v2816_v12  ;;  %v2830_v36 = vpop.f32.mrf.mxu2  ;;  %v2801_v0 = vpop.f32.mrf.mxu1 }
 0x300   : > { %v2831_v7 = vadd.f32 %v2830_v36, %v2801_v0 }
 0x301   : > { %v2877_v1 = vadd.f32 %v4645_v44, %v2865_v25  ;;  %v2863_v54 = vadd.f32 %v2845_v23, %v2201_v38  ;;  %v2182_v38 = vadd.f32 %v4629_v10, %v2153_v33  ;;  %v2185_v10 = vadd.f32 %v4633_v55, %v2156_v15 }
 0x302   : > { %v2187_v55 = vadd.f32 %v4637_v19, %v2158_v31 }
 0x303   : > { %v2885_v45 = vmax.f32 %v2877_v1, 0.0  ;;  %v2875_v62 = vadd.f32 %v4645_v44, %v2863_v54  ;;  %v2211_v59 = vadd.f32 %v4631_v2, %v2182_v38  ;;  %v2214_v60 = vadd.f32 %v4635_v32, %v2185_v10 }
 0x304   : > { %v2852_v3 = vpop.f32.mrf.mxu3  ;;  %v2216_v16 = vadd.f32 %v4640_v21, %v2187_v55 }
 0x305   : > { %2893 = vst [vmem:[%s4653_s10 + $0x18] sm:$0xff] %v2885_v45  ;;  %v2883_v49 = vmax.f32 %v2875_v62, 0.0  ;;  %v2853_v46 = vadd.f32 %v2852_v3, %v2824_v61 }
 0x307   : > { %2891 = vst [vmem:[%s4653_s10 + $0x8] sm:$0xff] %v2883_v49  ;;  %v2866_v13 = vadd.f32 %v2853_v46, %v2209_v26 }
 0x309   : > { %v2878_v18 = vadd.f32 %v4645_v44, %v2866_v13 }
 0x30b   : > { %v2886_v9 = vmax.f32 %v2878_v18, 0.0 }
 0x30c   : > { %v2854_v57 = vpop.f32.mrf.mxu3 }
 0x30d   : > { %2894 = vst [vmem:[%s4653_s10 + $0x20] sm:$0xff] %v2886_v9  ;;  %v2855_v29 = vadd.f32 %v2854_v57, %v2826_v20 }
 0x30f   : > { %v2867_v11 = vadd.f32 %v2855_v29, %v2211_v59 }
 0x311   : > { %v2879_v17 = vadd.f32 %v4645_v44, %v2867_v11 }
 0x313   : > { %v2887_v48 = vmax.f32 %v2879_v17, 0.0 }
 0x314   : > { %v2857_v5 = vpop.f32.mrf.mxu3 }
 0x315   : > { %2895 = vst [vmem:[%s4653_s10 + $0x28] sm:$0xff] %v2887_v48  ;;  %v2858_v2 = vadd.f32 %v2857_v5, %v2829_v52 }
 0x317   : > { %v2868_v37 = vadd.f32 %v2858_v2, %v2214_v60 }
 0x319   : > { %v2880_v14 = vadd.f32 %v4645_v44, %v2868_v37 }
 0x31b   : > { %v2888_v50 = vmax.f32 %v2880_v14, 0.0 }
 0x31c   : > { %v2859_v22 = vpop.f32.mrf.mxu3 }
 0x31d   : > { %2896 = vst [vmem:[%s4653_s10 + $0x30] sm:$0xff] %v2888_v50  ;;  %v2860_v8 = vadd.f32 %v2859_v22, %v2831_v7 }
 0x31f   : > { %v2869_v27 = vadd.f32 %v2860_v8, %v2216_v16 }
 0x321   : > { %v2881_v32 = vadd.f32 %v4645_v44, %v2869_v27 }
 0x323   : > { %v2889_v58 = vmax.f32 %v2881_v32, 0.0 }
 0x325   : > { %2897 = vst [vmem:[%s4653_s10 + $0x38] sm:$0xff] %v2889_v58 }
 0x326 PF: > { %s15_s18 = sadd.s32 1, %s3619_s18  }
 0x327   : > { %p12_p4 = scmp.ge.s32.totalorder %s15_s18, 4  }
 0x329   :  { %14 = sbr.rel (!%p12_p4) target bundleno = 1 (0x1), region = 78 }

</bundles_post_ra>
